<compile_context>
chip_gen: v5e
topology: v5e:2x2
jax: 0.10.0
libtpu: 0.0.40
codegen_flags: <defaults>
</compile_context>

<pallas_src>
import math

import jax
import jax.numpy as jnp
from jax import lax
from jax.experimental import pallas as pl
from jax.experimental.pallas import tpu as pltpu


# ----------------------- helpers (mirror the PyTorch module) -----------------

def _padding(downsample, kernel_size):
    return max(0, int(math.floor((kernel_size - downsample + 1) / 2)))


def _downsample(n_samples_in, n_samples_out):
    d = n_samples_in // n_samples_out
    assert d >= 1 and n_samples_in % n_samples_out == 0
    return d


def _conv_out_len(l_in, K, stride, pad):
    return (l_in + 2 * pad - K) // stride + 1


def _round_up(v, m):
    return -(-v // m) * m


# ------------------- in-kernel building blocks (per batch element) -----------

def _mm(a, b):
    """MXU matmul: bf16 operands, f32 accumulation."""
    return jnp.dot(a.astype(jnp.bfloat16), b.astype(jnp.bfloat16),
                   preferred_element_type=jnp.float32)


def _conv1d(a, w, bias, scratch, *, l_in, K, stride, pad, relu):
    """nn.Conv1d(bias=False) (+ folded BatchNorm affine, + optional ReLU).

    a:    (l_in, Cin) f32 activation (time on sublanes, channels on lanes)
    w:    (K*Cin, Cout) bf16 weight (BN scale folded per out-channel)
    bias: (1, Cout) f32 folded BN bias, or None

    Padding/stride handling: the activation is staged in a zeroed VMEM scratch
    buffer and each kernel tap is read back with a (possibly strided) pl.ds
    load; the conv itself is a single (t, K*Cin) x (K*Cin, Cout) MXU matmul.
    """
    cin = a.shape[1]
    t = _conv_out_len(l_in, K, stride, pad)
    if pad > 0:
        scratch[...] = jnp.zeros(scratch.shape, scratch.dtype)
    scratch[pad:pad + l_in, :cin] = a
    cols = []
    for k in range(K):
        idx = pl.ds(k, t) if stride == 1 else pl.ds(k, t, stride=stride)
        cols.append(scratch[idx, :cin])
    xcol = jnp.concatenate(cols, axis=1)                 # (t, K*Cin)
    y = _mm(xcol, w)                                     # (t, Cout), f32 acc
    if bias is not None:
        y = y + bias
    if relu:
        y = jnp.maximum(y, 0.0)
    return y, t


def _maxpool(a, scratch, *, l_in, ds):
    """MaxPool1d(kernel_size=stride=ds): ds strided loads + VPU max."""
    if ds == 1:
        return a, l_in
    cin = a.shape[1]
    t = l_in // ds
    scratch[0:l_in, :cin] = a
    out = scratch[pl.ds(0, t, stride=ds), :cin]
    for r in range(1, ds):
        out = jnp.maximum(out, scratch[pl.ds(r, t, stride=ds), :cin])
    return out, t


# ----------------------------- fused forward ---------------------------------

def resnet_mha_forward(x, params, cfg):
    """Whole ResNetMHA eval forward in a single pallas_call, grid over batch."""
    B, c_in0, L0 = x.shape
    K = cfg['kernel_size']
    H = cfg['n_heads']
    E = cfg['embed_dim']
    n_classes = cfg['n_classes']
    hd = E // H
    blocks = cfg['blocks']
    scr_rows, scr_cols = cfg['scratch_rows'], cfg['scratch_cols']

    # tiny input-layout op: (B, C, L) -> (B, L, C); per-batch tiles then map
    # directly to the (time-on-sublanes, channels-on-lanes) kernel layout.
    x2 = jnp.transpose(x, (0, 2, 1))

    names = list(params.keys())
    weights = [params[n] for n in names]

    def kernel(x_ref, *refs):
        R = dict(zip(names, refs[:len(names)]))
        out_ref = refs[len(names)]
        scratch = refs[len(names) + 1]

        a = x_ref[0].astype(jnp.float32)                 # (L0, Cin0)

        # conv1 + folded bn1 (reference applies no ReLU before block 0)
        a, l_cur = _conv1d(a, R['conv1_w'][...], R['conv1_b'][...], scratch,
                           l_in=L0, K=K, stride=cfg['ds0'], pad=cfg['pad0'],
                           relu=False)
        y = a                                            # initial skip

        # residual blocks: all activations stay in VMEM / vregs
        for i, blk in enumerate(blocks):
            ds = blk['ds']
            # skip path: MaxPool1d(ds), then 1x1 conv when channels change
            y, _ = _maxpool(y, scratch, l_in=l_cur, ds=ds)
            if blk['has_skip']:
                y = _mm(y, R[f'b{i}_skip_w'][...])
            # main path: conv1(+bn1 folded)+ReLU, then conv2 (stride=ds)
            a, l_mid = _conv1d(a, R[f'b{i}_c1_w'][...], R[f'b{i}_c1_b'][...],
                               scratch, l_in=l_cur, K=K, stride=1,
                               pad=blk['pad1'], relu=True)
            a, l_cur = _conv1d(a, R[f'b{i}_c2_w'][...], None, scratch,
                               l_in=l_mid, K=K, stride=ds, pad=blk['pad2'],
                               relu=False)
            s = a + y                    # residual sum; carried to next block
            y = s
            a = jnp.maximum(s * R[f'b{i}_bn2_s'][...] + R[f'b{i}_bn2_b'][...],
                            0.0)
            # dropout layers: eval mode -> identity

        # ---- multi-head self-attention (batch_first, per batch element) ---
        qkv = _mm(a, R['mha_win_t'][...]) + R['mha_bin'][...]   # (L, 3E)
        q, kk, v = qkv[:, :E], qkv[:, E:2 * E], qkv[:, 2 * E:]
        wo = R['mha_wo_t'][...]                                  # (E, E) bf16
        scale = 1.0 / math.sqrt(hd)
        attn = None
        for h in range(H):               # static head loop; no head concat
            sl = slice(h * hd, (h + 1) * hd)
            sc = lax.dot_general(q[:, sl].astype(jnp.bfloat16),
                                 kk[:, sl].astype(jnp.bfloat16),
                                 (((1,), (1,)), ((), ())),
                                 preferred_element_type=jnp.float32) * scale
            sc = sc - jnp.max(sc, axis=-1, keepdims=True)
            p = jnp.exp(sc)
            p = p * pl.reciprocal(jnp.sum(p, axis=-1, keepdims=True),
                                  approx=True)
            oh = _mm(p, v[:, sl])                                # (L, hd)
            contrib = _mm(oh, wo[sl, :])                         # (L, E)
            attn = contrib if attn is None else attn + contrib
        attn = attn + R['mha_bo'][...]                           # (L, E)

        # ---- AdaptiveMaxPool1d(1) over L + Linear --------------------------
        pooled = jnp.max(attn, axis=0, keepdims=True)            # (1, E)
        logits = _mm(pooled, R['lin_w_t'][...]) + R['lin_b'][...]
        out_ref[0] = logits.astype(out_ref.dtype)

    def _const_spec(w):
        nd = w.ndim
        return pl.BlockSpec(w.shape, lambda b: (0,) * nd)

    out = pl.pallas_call(
        kernel,
        grid=(B,),
        in_specs=[pl.BlockSpec((1, L0, c_in0), lambda b: (b, 0, 0))]
        + [_const_spec(w) for w in weights],
        out_specs=pl.BlockSpec((1, 1, n_classes), lambda b: (b, 0, 0)),
        out_shape=jax.ShapeDtypeStruct((B, 1, n_classes), x.dtype),
        scratch_shapes=[pltpu.VMEM((scr_rows, scr_cols), jnp.float32)],
        compiler_params=pltpu.CompilerParams(
            dimension_semantics=("parallel",)),
        cost_estimate=pl.CostEstimate(
            flops=int(cfg['flops'] * B),
            transcendentals=int(cfg['transcendentals'] * B),
            bytes_accessed=int(cfg['bytes_weights']
                               + x.size * x.dtype.itemsize
                               + B * n_classes * 4)),
    )(x2, *weights)
    return out.reshape(B, n_classes)


# ----------------------------- parameters ------------------------------------

def init_params(key, input_dim, blocks_dim, n_classes, kernel_size, n_heads):
    """Random eval-mode parameters, pre-folded / pre-laid-out for the kernel."""
    kit = iter(jax.random.split(key, 256))
    K = kernel_size

    def nrm(shape, scale=0.1):
        return (scale * jax.random.normal(next(kit), shape)).astype(jnp.float32)

    def bn_fold(c):
        # eval-mode BatchNorm folded to y = x*scale + bias
        gamma = 1.0 + 0.1 * jax.random.normal(next(kit), (c,))
        beta = 0.1 * jax.random.normal(next(kit), (c,))
        r_mean = 0.1 * jax.random.normal(next(kit), (c,))
        r_var = 1.0 + 0.5 * jax.random.uniform(next(kit), (c,))
        scale = gamma * jax.lax.rsqrt(r_var + 1e-5)
        bias = beta - r_mean * scale
        return scale.astype(jnp.float32), bias.astype(jnp.float32)

    def conv_as_2d(w):                      # (Cout, Cin, K) -> (K*Cin, Cout) bf16
        c_out, c_in, k = w.shape
        return (jnp.transpose(w, (2, 1, 0)).reshape(k * c_in, c_out)
                .astype(jnp.bfloat16))

    params = {}
    cfg = {'kernel_size': K, 'n_heads': n_heads, 'n_classes': n_classes}

    flops = 0
    max_rows, max_cin = 8, 1

    n_f_in, n_f_out = input_dim[0], blocks_dim[0][0]
    n_s_in, n_s_out = input_dim[1], blocks_dim[0][1]
    ds0 = _downsample(n_s_in, n_s_out)
    pad0 = _padding(ds0, K)
    cfg['ds0'], cfg['pad0'] = ds0, pad0
    w = nrm((n_f_out, n_f_in, K))
    s1, b1 = bn_fold(n_f_out)
    params['conv1_w'] = conv_as_2d(w * s1[:, None, None])    # bn1 folded in
    params['conv1_b'] = b1.reshape(1, n_f_out)
    max_rows = max(max_rows, n_s_in + 2 * pad0)
    max_cin = max(max_cin, n_f_in)
    l_cur = _conv_out_len(n_s_in, K, ds0, pad0)
    flops += 2 * l_cur * (K * n_f_in) * n_f_out

    blocks = []
    for i, (n_f, n_s) in enumerate(blocks_dim):
        n_f_in, n_f_out = n_f_out, n_f
        n_s_in, n_s_out = n_s_out, n_s
        ds = _downsample(n_s_in, n_s_out)
        pad1, pad2 = _padding(1, K), _padding(ds, K)
        blk = {'ds': ds, 'pad1': pad1, 'pad2': pad2,
               'has_skip': n_f_in != n_f_out}
        w1 = nrm((n_f_out, n_f_in, K))
        s_, b_ = bn_fold(n_f_out)
        params[f'b{i}_c1_w'] = conv_as_2d(w1 * s_[:, None, None])  # bn1 folded
        params[f'b{i}_c1_b'] = b_.reshape(1, n_f_out)
        w2 = nrm((n_f_out, n_f_out, K))
        params[f'b{i}_c2_w'] = conv_as_2d(w2)        # bn2 acts after the add
        s2, b2 = bn_fold(n_f_out)
        params[f'b{i}_bn2_s'] = s2.reshape(1, n_f_out)
        params[f'b{i}_bn2_b'] = b2.reshape(1, n_f_out)
        if blk['has_skip']:
            wsk = nrm((n_f_out, n_f_in, 1))
            params[f'b{i}_skip_w'] = wsk[:, :, 0].T.astype(jnp.bfloat16)
        blocks.append(blk)

        # scratch-size / cost bookkeeping (same length formulas as the kernel)
        max_rows = max(max_rows, l_cur)                  # maxpool staging
        max_cin = max(max_cin, n_f_in)
        l_mid = _conv_out_len(l_cur, K, 1, pad1)
        max_rows = max(max_rows, l_cur + 2 * pad1)
        flops += 2 * l_mid * (K * n_f_in) * n_f_out
        l_out = _conv_out_len(l_mid, K, ds, pad2)
        max_rows = max(max_rows, l_mid + 2 * pad2)
        max_cin = max(max_cin, n_f_out)
        flops += 2 * l_out * (K * n_f_out) * n_f_out
        if blk['has_skip']:
            flops += 2 * (l_cur // ds) * n_f_in * n_f_out
        l_cur = l_out
    cfg['blocks'] = blocks

    E = blocks_dim[-1][0]
    assert E % n_heads == 0
    hd = E // n_heads
    L_att = l_cur
    cfg['embed_dim'] = E
    cfg['l_att'] = L_att
    in_proj_w = nrm((3 * E, E))              # nn.MultiheadAttention.in_proj_weight
    in_proj_b = nrm((3 * E,), 0.05)
    out_proj_w = nrm((E, E))
    params['mha_win_t'] = in_proj_w.T.astype(jnp.bfloat16)  # (E, 3E) packed q|k|v
    params['mha_bin'] = in_proj_b.reshape(1, 3 * E)
    params['mha_wo_t'] = out_proj_w.T.astype(jnp.bfloat16)
    params['mha_bo'] = nrm((E,), 0.05).reshape(1, E)

    lin_w = nrm((n_classes, E))
    params['lin_w_t'] = lin_w.T.astype(jnp.bfloat16)
    params['lin_b'] = nrm((n_classes,), 0.05).reshape(1, n_classes)

    flops += 2 * L_att * E * 3 * E                    # packed QKV projection
    flops += 2 * 2 * n_heads * L_att * L_att * hd     # scores + p @ v
    flops += 2 * L_att * E * E                        # output projection
    flops += 2 * E * n_classes                        # final linear
    cfg['flops'] = flops
    cfg['transcendentals'] = n_heads * L_att * L_att
    cfg['scratch_rows'] = _round_up(max_rows, 8)
    cfg['scratch_cols'] = _round_up(max_cin, 128)
    cfg['bytes_weights'] = int(sum(v.size * v.dtype.itemsize
                                   for v in params.values()))
    return params, cfg


# ----------------------------- main -------------------------------------------

if __name__ == "__main__":
    key = jax.random.PRNGKey(0)
    k_x, k_p = jax.random.split(key)

    # small, module-consistent config
    input_dim = (8, 64)                 # (n_filters, n_samples)
    blocks_dim = [(16, 32), (32, 16)]   # sample counts decrease by integer factors
    n_classes = 5
    kernel_size = 7                     # odd, as required
    n_heads = 4

    params, cfg = init_params(k_p, input_dim, blocks_dim, n_classes,
                              kernel_size, n_heads)
    x = jax.random.normal(k_x, (2, input_dim[0], input_dim[1]), jnp.float32)

    out = resnet_mha_forward(x, params, cfg)
    jax.block_until_ready(out)
    assert out.shape == (2, n_classes)
    assert bool(jnp.isfinite(out).all())
    print("KERNEL_OK")
</pallas_src>

<mosaic_0001>
module attributes {stable_mosaic.version = 11 : i64} {
  func.func @kernel(%arg0: i32, %arg1: memref<1x64x8xf32, #tpu.memory_space<vmem>>, %arg2: memref<56x16xbf16, #tpu.memory_space<vmem>>, %arg3: memref<1x16xf32, #tpu.memory_space<vmem>>, %arg4: memref<112x16xbf16, #tpu.memory_space<vmem>>, %arg5: memref<1x16xf32, #tpu.memory_space<vmem>>, %arg6: memref<112x16xbf16, #tpu.memory_space<vmem>>, %arg7: memref<1x16xf32, #tpu.memory_space<vmem>>, %arg8: memref<1x16xf32, #tpu.memory_space<vmem>>, %arg9: memref<112x32xbf16, #tpu.memory_space<vmem>>, %arg10: memref<1x32xf32, #tpu.memory_space<vmem>>, %arg11: memref<224x32xbf16, #tpu.memory_space<vmem>>, %arg12: memref<1x32xf32, #tpu.memory_space<vmem>>, %arg13: memref<1x32xf32, #tpu.memory_space<vmem>>, %arg14: memref<16x32xbf16, #tpu.memory_space<vmem>>, %arg15: memref<32x96xbf16, #tpu.memory_space<vmem>>, %arg16: memref<1x96xf32, #tpu.memory_space<vmem>>, %arg17: memref<32x32xbf16, #tpu.memory_space<vmem>>, %arg18: memref<1x32xf32, #tpu.memory_space<vmem>>, %arg19: memref<32x5xbf16, #tpu.memory_space<vmem>>, %arg20: memref<1x5xf32, #tpu.memory_space<vmem>>, %arg21: memref<1x1x5xf32, #tpu.memory_space<vmem>>, %arg22: memref<72x128xf32, #tpu.memory_space<vmem>>) attributes {dimension_semantics = [#tpu.dimension_semantics<parallel>], iteration_bounds = array<i64: 2>, scalar_prefetch = 0 : i64, scratch_operands = 1 : i64, tpu.core_type = #tpu.core_type<tc>, window_params = [{transform_indices = @transform_0, window_bounds = array<i64: 1, 64, 8>}, {pipeline_mode = #tpu.pipeline_mode<synchronous>, transform_indices = @transform_1, window_bounds = array<i64: 56, 16>}, {pipeline_mode = #tpu.pipeline_mode<synchronous>, transform_indices = @transform_2, window_bounds = array<i64: 1, 16>}, {pipeline_mode = #tpu.pipeline_mode<synchronous>, transform_indices = @transform_3, window_bounds = array<i64: 112, 16>}, {pipeline_mode = #tpu.pipeline_mode<synchronous>, transform_indices = @transform_4, window_bounds = array<i64: 1, 16>}, {pipeline_mode = #tpu.pipeline_mode<synchronous>, transform_indices = @transform_5, window_bounds = array<i64: 112, 16>}, {pipeline_mode = #tpu.pipeline_mode<synchronous>, transform_indices = @transform_6, window_bounds = array<i64: 1, 16>}, {pipeline_mode = #tpu.pipeline_mode<synchronous>, transform_indices = @transform_7, window_bounds = array<i64: 1, 16>}, {pipeline_mode = #tpu.pipeline_mode<synchronous>, transform_indices = @transform_8, window_bounds = array<i64: 112, 32>}, {pipeline_mode = #tpu.pipeline_mode<synchronous>, transform_indices = @transform_9, window_bounds = array<i64: 1, 32>}, {pipeline_mode = #tpu.pipeline_mode<synchronous>, transform_indices = @transform_10, window_bounds = array<i64: 224, 32>}, {pipeline_mode = #tpu.pipeline_mode<synchronous>, transform_indices = @transform_11, window_bounds = array<i64: 1, 32>}, {pipeline_mode = #tpu.pipeline_mode<synchronous>, transform_indices = @transform_12, window_bounds = array<i64: 1, 32>}, {pipeline_mode = #tpu.pipeline_mode<synchronous>, transform_indices = @transform_13, window_bounds = array<i64: 16, 32>}, {pipeline_mode = #tpu.pipeline_mode<synchronous>, transform_indices = @transform_14, window_bounds = array<i64: 32, 96>}, {pipeline_mode = #tpu.pipeline_mode<synchronous>, transform_indices = @transform_15, window_bounds = array<i64: 1, 96>}, {pipeline_mode = #tpu.pipeline_mode<synchronous>, transform_indices = @transform_16, window_bounds = array<i64: 32, 32>}, {pipeline_mode = #tpu.pipeline_mode<synchronous>, transform_indices = @transform_17, window_bounds = array<i64: 1, 32>}, {pipeline_mode = #tpu.pipeline_mode<synchronous>, transform_indices = @transform_18, window_bounds = array<i64: 32, 5>}, {pipeline_mode = #tpu.pipeline_mode<synchronous>, transform_indices = @transform_19, window_bounds = array<i64: 1, 5>}, {transform_indices = @transform_20, window_bounds = array<i64: 1, 1, 5>}]} {
    %c0 = arith.constant 0 : index
    %c0_0 = arith.constant 0 : index
    %c0_1 = arith.constant 0 : index
    %0 = vector.load %arg1[%c0, %c0_0, %c0_1] : memref<1x64x8xf32, #tpu.memory_space<vmem>>, vector<1x64x8xf32>
    %1 = vector.shape_cast %0 : vector<1x64x8xf32> to vector<64x8xf32>
    %c0_2 = arith.constant 0 : index
    %c0_3 = arith.constant 0 : index
    %2 = vector.load %arg2[%c0_2, %c0_3] : memref<56x16xbf16, #tpu.memory_space<vmem>>, vector<56x16xbf16>
    %c0_4 = arith.constant 0 : index
    %c0_5 = arith.constant 0 : index
    %3 = vector.load %arg3[%c0_4, %c0_5] : memref<1x16xf32, #tpu.memory_space<vmem>>, vector<1x16xf32>
    %cst = arith.constant 0.000000e+00 : f32
    %4 = vector.broadcast %cst : f32 to vector<72x128xf32>
    %c0_6 = arith.constant 0 : index
    %c0_7 = arith.constant 0 : index
    %5 = vector.load %arg22[%c0_6, %c0_7] : memref<72x128xf32, #tpu.memory_space<vmem>>, vector<72x128xf32>
    tpu.vector_store %arg22[%c0_6, %c0_7], %4 {strides = array<i32>} : memref<72x128xf32, #tpu.memory_space<vmem>>, vector<72x128xf32>,
    %c3 = arith.constant 3 : index
    %c0_8 = arith.constant 0 : index
    %6 = vector.load %arg22[%c3, %c0_8] : memref<72x128xf32, #tpu.memory_space<vmem>>, vector<64x8xf32>
    tpu.vector_store %arg22[%c3, %c0_8], %1 {strides = array<i32>} : memref<72x128xf32, #tpu.memory_space<vmem>>, vector<64x8xf32>,
    %c0_9 = arith.constant 0 : index
    %c0_10 = arith.constant 0 : index
    %7 = tpu.strided_load %arg22[%c0_9, %c0_10] {strides = array<i32: 2, 1>} : memref<72x128xf32, #tpu.memory_space<vmem>>, vector<32x8xf32>
    %c1 = arith.constant 1 : index
    %c0_11 = arith.constant 0 : index
    %8 = tpu.strided_load %arg22[%c1, %c0_11] {strides = array<i32: 2, 1>} : memref<72x128xf32, #tpu.memory_space<vmem>>, vector<32x8xf32>
    %c2 = arith.constant 2 : index
    %c0_12 = arith.constant 0 : index
    %9 = tpu.strided_load %arg22[%c2, %c0_12] {strides = array<i32: 2, 1>} : memref<72x128xf32, #tpu.memory_space<vmem>>, vector<32x8xf32>
    %c3_13 = arith.constant 3 : index
    %c0_14 = arith.constant 0 : index
    %10 = tpu.strided_load %arg22[%c3_13, %c0_14] {strides = array<i32: 2, 1>} : memref<72x128xf32, #tpu.memory_space<vmem>>, vector<32x8xf32>
    %c4 = arith.constant 4 : index
    %c0_15 = arith.constant 0 : index
    %11 = tpu.strided_load %arg22[%c4, %c0_15] {strides = array<i32: 2, 1>} : memref<72x128xf32, #tpu.memory_space<vmem>>, vector<32x8xf32>
    %c5 = arith.constant 5 : index
    %c0_16 = arith.constant 0 : index
    %12 = tpu.strided_load %arg22[%c5, %c0_16] {strides = array<i32: 2, 1>} : memref<72x128xf32, #tpu.memory_space<vmem>>, vector<32x8xf32>
    %c6 = arith.constant 6 : index
    %c0_17 = arith.constant 0 : index
    %13 = tpu.strided_load %arg22[%c6, %c0_17] {strides = array<i32: 2, 1>} : memref<72x128xf32, #tpu.memory_space<vmem>>, vector<32x8xf32>
    %14 = tpu.concatenate %7, %8, %9, %10, %11, %12, %13 in 1 : vector<32x8xf32>, vector<32x8xf32>, vector<32x8xf32>, vector<32x8xf32>, vector<32x8xf32>, vector<32x8xf32>, vector<32x8xf32> -> vector<32x56xf32>
    %15 = arith.truncf %14 : vector<32x56xf32> to vector<32x56xbf16>
    %cst_18 = arith.constant dense<0.000000e+00> : vector<32x16xf32>
    %16 = tpu.matmul %15, %2, %cst_18 {dimension_numbers = #tpu.dot_dimension_numbers<[1], [0], [0], [1], [0, 0, 1, 1], [], []>} : vector<32x56xbf16>, vector<56x16xbf16>, vector<32x16xf32> -> vector<32x16xf32>
    %17 = vector.broadcast %3 : vector<1x16xf32> to vector<32x16xf32>
    %18 = arith.addf %16, %17 : vector<32x16xf32>
    %c0_19 = arith.constant 0 : index
    %c0_20 = arith.constant 0 : index
    %19 = vector.load %arg4[%c0_19, %c0_20] : memref<112x16xbf16, #tpu.memory_space<vmem>>, vector<112x16xbf16>
    %c0_21 = arith.constant 0 : index
    %c0_22 = arith.constant 0 : index
    %20 = vector.load %arg5[%c0_21, %c0_22] : memref<1x16xf32, #tpu.memory_space<vmem>>, vector<1x16xf32>
    %cst_23 = arith.constant 0.000000e+00 : f32
    %21 = vector.broadcast %cst_23 : f32 to vector<72x128xf32>
    %c0_24 = arith.constant 0 : index
    %c0_25 = arith.constant 0 : index
    %22 = vector.load %arg22[%c0_24, %c0_25] : memref<72x128xf32, #tpu.memory_space<vmem>>, vector<72x128xf32>
    tpu.vector_store %arg22[%c0_24, %c0_25], %21 {strides = array<i32>} : memref<72x128xf32, #tpu.memory_space<vmem>>, vector<72x128xf32>,
    %c3_26 = arith.constant 3 : index
    %c0_27 = arith.constant 0 : index
    %23 = vector.load %arg22[%c3_26, %c0_27] : memref<72x128xf32, #tpu.memory_space<vmem>>, vector<32x16xf32>
    tpu.vector_store %arg22[%c3_26, %c0_27], %18 {strides = array<i32>} : memref<72x128xf32, #tpu.memory_space<vmem>>, vector<32x16xf32>,
    %c0_28 = arith.constant 0 : index
    %c0_29 = arith.constant 0 : index
    %24 = vector.load %arg22[%c0_28, %c0_29] : memref<72x128xf32, #tpu.memory_space<vmem>>, vector<32x16xf32>
    %c1_30 = arith.constant 1 : index
    %c0_31 = arith.constant 0 : index
    %25 = vector.load %arg22[%c1_30, %c0_31] : memref<72x128xf32, #tpu.memory_space<vmem>>, vector<32x16xf32>
    %c2_32 = arith.constant 2 : index
    %c0_33 = arith.constant 0 : index
    %26 = vector.load %arg22[%c2_32, %c0_33] : memref<72x128xf32, #tpu.memory_space<vmem>>, vector<32x16xf32>
    %c3_34 = arith.constant 3 : index
    %c0_35 = arith.constant 0 : index
    %27 = vector.load %arg22[%c3_34, %c0_35] : memref<72x128xf32, #tpu.memory_space<vmem>>, vector<32x16xf32>
    %c4_36 = arith.constant 4 : index
    %c0_37 = arith.constant 0 : index
    %28 = vector.load %arg22[%c4_36, %c0_37] : memref<72x128xf32, #tpu.memory_space<vmem>>, vector<32x16xf32>
    %c5_38 = arith.constant 5 : index
    %c0_39 = arith.constant 0 : index
    %29 = vector.load %arg22[%c5_38, %c0_39] : memref<72x128xf32, #tpu.memory_space<vmem>>, vector<32x16xf32>
    %c6_40 = arith.constant 6 : index
    %c0_41 = arith.constant 0 : index
    %30 = vector.load %arg22[%c6_40, %c0_41] : memref<72x128xf32, #tpu.memory_space<vmem>>, vector<32x16xf32>
    %31 = tpu.concatenate %24, %25, %26, %27, %28, %29, %30 in 1 : vector<32x16xf32>, vector<32x16xf32>, vector<32x16xf32>, vector<32x16xf32>, vector<32x16xf32>, vector<32x16xf32>, vector<32x16xf32> -> vector<32x112xf32>
    %32 = arith.truncf %31 : vector<32x112xf32> to vector<32x112xbf16>
    %cst_42 = arith.constant dense<0.000000e+00> : vector<32x16xf32>
    %33 = tpu.matmul %32, %19, %cst_42 {dimension_numbers = #tpu.dot_dimension_numbers<[1], [0], [0], [1], [0, 0, 1, 1], [], []>} : vector<32x112xbf16>, vector<112x16xbf16>, vector<32x16xf32> -> vector<32x16xf32>
    %34 = vector.broadcast %20 : vector<1x16xf32> to vector<32x16xf32>
    %35 = arith.addf %33, %34 : vector<32x16xf32>
    %cst_43 = arith.constant 0.000000e+00 : f32
    %36 = vector.broadcast %cst_43 : f32 to vector<32x16xf32>
    %37 = arith.maximumf %35, %36 : vector<32x16xf32>
    %c0_44 = arith.constant 0 : index
    %c0_45 = arith.constant 0 : index
    %38 = vector.load %arg6[%c0_44, %c0_45] : memref<112x16xbf16, #tpu.memory_space<vmem>>, vector<112x16xbf16>
    %cst_46 = arith.constant 0.000000e+00 : f32
    %39 = vector.broadcast %cst_46 : f32 to vector<72x128xf32>
    %c0_47 = arith.constant 0 : index
    %c0_48 = arith.constant 0 : index
    %40 = vector.load %arg22[%c0_47, %c0_48] : memref<72x128xf32, #tpu.memory_space<vmem>>, vector<72x128xf32>
    tpu.vector_store %arg22[%c0_47, %c0_48], %39 {strides = array<i32>} : memref<72x128xf32, #tpu.memory_space<vmem>>, vector<72x128xf32>,
    %c3_49 = arith.constant 3 : index
    %c0_50 = arith.constant 0 : index
    %41 = vector.load %arg22[%c3_49, %c0_50] : memref<72x128xf32, #tpu.memory_space<vmem>>, vector<32x16xf32>
    tpu.vector_store %arg22[%c3_49, %c0_50], %37 {strides = array<i32>} : memref<72x128xf32, #tpu.memory_space<vmem>>, vector<32x16xf32>,
    %c0_51 = arith.constant 0 : index
    %c0_52 = arith.constant 0 : index
    %42 = vector.load %arg22[%c0_51, %c0_52] : memref<72x128xf32, #tpu.memory_space<vmem>>, vector<32x16xf32>
    %c1_53 = arith.constant 1 : index
    %c0_54 = arith.constant 0 : index
    %43 = vector.load %arg22[%c1_53, %c0_54] : memref<72x128xf32, #tpu.memory_space<vmem>>, vector<32x16xf32>
    %c2_55 = arith.constant 2 : index
    %c0_56 = arith.constant 0 : index
    %44 = vector.load %arg22[%c2_55, %c0_56] : memref<72x128xf32, #tpu.memory_space<vmem>>, vector<32x16xf32>
    %c3_57 = arith.constant 3 : index
    %c0_58 = arith.constant 0 : index
    %45 = vector.load %arg22[%c3_57, %c0_58] : memref<72x128xf32, #tpu.memory_space<vmem>>, vector<32x16xf32>
    %c4_59 = arith.constant 4 : index
    %c0_60 = arith.constant 0 : index
    %46 = vector.load %arg22[%c4_59, %c0_60] : memref<72x128xf32, #tpu.memory_space<vmem>>, vector<32x16xf32>
    %c5_61 = arith.constant 5 : index
    %c0_62 = arith.constant 0 : index
    %47 = vector.load %arg22[%c5_61, %c0_62] : memref<72x128xf32, #tpu.memory_space<vmem>>, vector<32x16xf32>
    %c6_63 = arith.constant 6 : index
    %c0_64 = arith.constant 0 : index
    %48 = vector.load %arg22[%c6_63, %c0_64] : memref<72x128xf32, #tpu.memory_space<vmem>>, vector<32x16xf32>
    %49 = tpu.concatenate %42, %43, %44, %45, %46, %47, %48 in 1 : vector<32x16xf32>, vector<32x16xf32>, vector<32x16xf32>, vector<32x16xf32>, vector<32x16xf32>, vector<32x16xf32>, vector<32x16xf32> -> vector<32x112xf32>
    %50 = arith.truncf %49 : vector<32x112xf32> to vector<32x112xbf16>
    %cst_65 = arith.constant dense<0.000000e+00> : vector<32x16xf32>
    %51 = tpu.matmul %50, %38, %cst_65 {dimension_numbers = #tpu.dot_dimension_numbers<[1], [0], [0], [1], [0, 0, 1, 1], [], []>} : vector<32x112xbf16>, vector<112x16xbf16>, vector<32x16xf32> -> vector<32x16xf32>
    %52 = arith.addf %51, %18 : vector<32x16xf32>
    %c0_66 = arith.constant 0 : index
    %c0_67 = arith.constant 0 : index
    %53 = vector.load %arg7[%c0_66, %c0_67] : memref<1x16xf32, #tpu.memory_space<vmem>>, vector<1x16xf32>
    %54 = vector.broadcast %53 : vector<1x16xf32> to vector<32x16xf32>
    %55 = arith.mulf %52, %54 : vector<32x16xf32>
    %c0_68 = arith.constant 0 : index
    %c0_69 = arith.constant 0 : index
    %56 = vector.load %arg8[%c0_68, %c0_69] : memref<1x16xf32, #tpu.memory_space<vmem>>, vector<1x16xf32>
    %57 = vector.broadcast %56 : vector<1x16xf32> to vector<32x16xf32>
    %58 = arith.addf %55, %57 : vector<32x16xf32>
    %cst_70 = arith.constant 0.000000e+00 : f32
    %59 = vector.broadcast %cst_70 : f32 to vector<32x16xf32>
    %60 = arith.maximumf %58, %59 : vector<32x16xf32>
    %c0_71 = arith.constant 0 : index
    %c0_72 = arith.constant 0 : index
    %61 = vector.load %arg22[%c0_71, %c0_72] : memref<72x128xf32, #tpu.memory_space<vmem>>, vector<32x16xf32>
    tpu.vector_store %arg22[%c0_71, %c0_72], %52 {strides = array<i32>} : memref<72x128xf32, #tpu.memory_space<vmem>>, vector<32x16xf32>,
    %c0_73 = arith.constant 0 : index
    %c0_74 = arith.constant 0 : index
    %62 = tpu.strided_load %arg22[%c0_73, %c0_74] {strides = array<i32: 2, 1>} : memref<72x128xf32, #tpu.memory_space<vmem>>, vector<16x16xf32>
    %c1_75 = arith.constant 1 : index
    %c0_76 = arith.constant 0 : index
    %63 = tpu.strided_load %arg22[%c1_75, %c0_76] {strides = array<i32: 2, 1>} : memref<72x128xf32, #tpu.memory_space<vmem>>, vector<16x16xf32>
    %64 = arith.maximumf %62, %63 : vector<16x16xf32>
    %c0_77 = arith.constant 0 : index
    %c0_78 = arith.constant 0 : index
    %65 = vector.load %arg14[%c0_77, %c0_78] : memref<16x32xbf16, #tpu.memory_space<vmem>>, vector<16x32xbf16>
    %66 = arith.truncf %64 : vector<16x16xf32> to vector<16x16xbf16>
    %cst_79 = arith.constant dense<0.000000e+00> : vector<16x32xf32>
    %67 = tpu.matmul %66, %65, %cst_79 {dimension_numbers = #tpu.dot_dimension_numbers<[1], [0], [0], [1], [0, 0, 1, 1], [], []>} : vector<16x16xbf16>, vector<16x32xbf16>, vector<16x32xf32> -> vector<16x32xf32>
    %c0_80 = arith.constant 0 : index
    %c0_81 = arith.constant 0 : index
    %68 = vector.load %arg9[%c0_80, %c0_81] : memref<112x32xbf16, #tpu.memory_space<vmem>>, vector<112x32xbf16>
    %c0_82 = arith.constant 0 : index
    %c0_83 = arith.constant 0 : index
    %69 = vector.load %arg10[%c0_82, %c0_83] : memref<1x32xf32, #tpu.memory_space<vmem>>, vector<1x32xf32>
    %cst_84 = arith.constant 0.000000e+00 : f32
    %70 = vector.broadcast %cst_84 : f32 to vector<72x128xf32>
    %c0_85 = arith.constant 0 : index
    %c0_86 = arith.constant 0 : index
    %71 = vector.load %arg22[%c0_85, %c0_86] : memref<72x128xf32, #tpu.memory_space<vmem>>, vector<72x128xf32>
    tpu.vector_store %arg22[%c0_85, %c0_86], %70 {strides = array<i32>} : memref<72x128xf32, #tpu.memory_space<vmem>>, vector<72x128xf32>,
    %c3_87 = arith.constant 3 : index
    %c0_88 = arith.constant 0 : index
    %72 = vector.load %arg22[%c3_87, %c0_88] : memref<72x128xf32, #tpu.memory_space<vmem>>, vector<32x16xf32>
    tpu.vector_store %arg22[%c3_87, %c0_88], %60 {strides = array<i32>} : memref<72x128xf32, #tpu.memory_space<vmem>>, vector<32x16xf32>,
    %c0_89 = arith.constant 0 : index
    %c0_90 = arith.constant 0 : index
    %73 = vector.load %arg22[%c0_89, %c0_90] : memref<72x128xf32, #tpu.memory_space<vmem>>, vector<32x16xf32>
    %c1_91 = arith.constant 1 : index
    %c0_92 = arith.constant 0 : index
    %74 = vector.load %arg22[%c1_91, %c0_92] : memref<72x128xf32, #tpu.memory_space<vmem>>, vector<32x16xf32>
    %c2_93 = arith.constant 2 : index
    %c0_94 = arith.constant 0 : index
    %75 = vector.load %arg22[%c2_93, %c0_94] : memref<72x128xf32, #tpu.memory_space<vmem>>, vector<32x16xf32>
    %c3_95 = arith.constant 3 : index
    %c0_96 = arith.constant 0 : index
    %76 = vector.load %arg22[%c3_95, %c0_96] : memref<72x128xf32, #tpu.memory_space<vmem>>, vector<32x16xf32>
    %c4_97 = arith.constant 4 : index
    %c0_98 = arith.constant 0 : index
    %77 = vector.load %arg22[%c4_97, %c0_98] : memref<72x128xf32, #tpu.memory_space<vmem>>, vector<32x16xf32>
    %c5_99 = arith.constant 5 : index
    %c0_100 = arith.constant 0 : index
    %78 = vector.load %arg22[%c5_99, %c0_100] : memref<72x128xf32, #tpu.memory_space<vmem>>, vector<32x16xf32>
    %c6_101 = arith.constant 6 : index
    %c0_102 = arith.constant 0 : index
    %79 = vector.load %arg22[%c6_101, %c0_102] : memref<72x128xf32, #tpu.memory_space<vmem>>, vector<32x16xf32>
    %80 = tpu.concatenate %73, %74, %75, %76, %77, %78, %79 in 1 : vector<32x16xf32>, vector<32x16xf32>, vector<32x16xf32>, vector<32x16xf32>, vector<32x16xf32>, vector<32x16xf32>, vector<32x16xf32> -> vector<32x112xf32>
    %81 = arith.truncf %80 : vector<32x112xf32> to vector<32x112xbf16>
    %cst_103 = arith.constant dense<0.000000e+00> : vector<32x32xf32>
    %82 = tpu.matmul %81, %68, %cst_103 {dimension_numbers = #tpu.dot_dimension_numbers<[1], [0], [0], [1], [0, 0, 1, 1], [], []>} : vector<32x112xbf16>, vector<112x32xbf16>, vector<32x32xf32> -> vector<32x32xf32>
    %83 = vector.broadcast %69 : vector<1x32xf32> to vector<32x32xf32>
    %84 = arith.addf %82, %83 : vector<32x32xf32>
    %cst_104 = arith.constant 0.000000e+00 : f32
    %85 = vector.broadcast %cst_104 : f32 to vector<32x32xf32>
    %86 = arith.maximumf %84, %85 : vector<32x32xf32>
    %c0_105 = arith.constant 0 : index
    %c0_106 = arith.constant 0 : index
    %87 = vector.load %arg11[%c0_105, %c0_106] : memref<224x32xbf16, #tpu.memory_space<vmem>>, vector<224x32xbf16>
    %cst_107 = arith.constant 0.000000e+00 : f32
    %88 = vector.broadcast %cst_107 : f32 to vector<72x128xf32>
    %c0_108 = arith.constant 0 : index
    %c0_109 = arith.constant 0 : index
    %89 = vector.load %arg22[%c0_108, %c0_109] : memref<72x128xf32, #tpu.memory_space<vmem>>, vector<72x128xf32>
    tpu.vector_store %arg22[%c0_108, %c0_109], %88 {strides = array<i32>} : memref<72x128xf32, #tpu.memory_space<vmem>>, vector<72x128xf32>,
    %c3_110 = arith.constant 3 : index
    %c0_111 = arith.constant 0 : index
    %90 = vector.load %arg22[%c3_110, %c0_111] : memref<72x128xf32, #tpu.memory_space<vmem>>, vector<32x32xf32>
    tpu.vector_store %arg22[%c3_110, %c0_111], %86 {strides = array<i32>} : memref<72x128xf32, #tpu.memory_space<vmem>>, vector<32x32xf32>,
    %c0_112 = arith.constant 0 : index
    %c0_113 = arith.constant 0 : index
    %91 = tpu.strided_load %arg22[%c0_112, %c0_113] {strides = array<i32: 2, 1>} : memref<72x128xf32, #tpu.memory_space<vmem>>, vector<16x32xf32>
    %c1_114 = arith.constant 1 : index
    %c0_115 = arith.constant 0 : index
    %92 = tpu.strided_load %arg22[%c1_114, %c0_115] {strides = array<i32: 2, 1>} : memref<72x128xf32, #tpu.memory_space<vmem>>, vector<16x32xf32>
    %c2_116 = arith.constant 2 : index
    %c0_117 = arith.constant 0 : index
    %93 = tpu.strided_load %arg22[%c2_116, %c0_117] {strides = array<i32: 2, 1>} : memref<72x128xf32, #tpu.memory_space<vmem>>, vector<16x32xf32>
    %c3_118 = arith.constant 3 : index
    %c0_119 = arith.constant 0 : index
    %94 = tpu.strided_load %arg22[%c3_118, %c0_119] {strides = array<i32: 2, 1>} : memref<72x128xf32, #tpu.memory_space<vmem>>, vector<16x32xf32>
    %c4_120 = arith.constant 4 : index
    %c0_121 = arith.constant 0 : index
    %95 = tpu.strided_load %arg22[%c4_120, %c0_121] {strides = array<i32: 2, 1>} : memref<72x128xf32, #tpu.memory_space<vmem>>, vector<16x32xf32>
    %c5_122 = arith.constant 5 : index
    %c0_123 = arith.constant 0 : index
    %96 = tpu.strided_load %arg22[%c5_122, %c0_123] {strides = array<i32: 2, 1>} : memref<72x128xf32, #tpu.memory_space<vmem>>, vector<16x32xf32>
    %c6_124 = arith.constant 6 : index
    %c0_125 = arith.constant 0 : index
    %97 = tpu.strided_load %arg22[%c6_124, %c0_125] {strides = array<i32: 2, 1>} : memref<72x128xf32, #tpu.memory_space<vmem>>, vector<16x32xf32>
    %98 = tpu.concatenate %91, %92, %93, %94, %95, %96, %97 in 1 : vector<16x32xf32>, vector<16x32xf32>, vector<16x32xf32>, vector<16x32xf32>, vector<16x32xf32>, vector<16x32xf32>, vector<16x32xf32> -> vector<16x224xf32>
    %99 = arith.truncf %98 : vector<16x224xf32> to vector<16x224xbf16>
    %cst_126 = arith.constant dense<0.000000e+00> : vector<16x32xf32>
    %100 = tpu.matmul %99, %87, %cst_126 {dimension_numbers = #tpu.dot_dimension_numbers<[1], [0], [0], [1], [0, 0, 1, 1], [], []>} : vector<16x224xbf16>, vector<224x32xbf16>, vector<16x32xf32> -> vector<16x32xf32>
    %101 = arith.addf %100, %67 : vector<16x32xf32>
    %c0_127 = arith.constant 0 : index
    %c0_128 = arith.constant 0 : index
    %102 = vector.load %arg12[%c0_127, %c0_128] : memref<1x32xf32, #tpu.memory_space<vmem>>, vector<1x32xf32>
    %103 = vector.broadcast %102 : vector<1x32xf32> to vector<16x32xf32>
    %104 = arith.mulf %101, %103 : vector<16x32xf32>
    %c0_129 = arith.constant 0 : index
    %c0_130 = arith.constant 0 : index
    %105 = vector.load %arg13[%c0_129, %c0_130] : memref<1x32xf32, #tpu.memory_space<vmem>>, vector<1x32xf32>
    %106 = vector.broadcast %105 : vector<1x32xf32> to vector<16x32xf32>
    %107 = arith.addf %104, %106 : vector<16x32xf32>
    %cst_131 = arith.constant 0.000000e+00 : f32
    %108 = vector.broadcast %cst_131 : f32 to vector<16x32xf32>
    %109 = arith.maximumf %107, %108 : vector<16x32xf32>
    %c0_132 = arith.constant 0 : index
    %c0_133 = arith.constant 0 : index
    %110 = vector.load %arg15[%c0_132, %c0_133] : memref<32x96xbf16, #tpu.memory_space<vmem>>, vector<32x96xbf16>
    %111 = arith.truncf %109 : vector<16x32xf32> to vector<16x32xbf16>
    %cst_134 = arith.constant dense<0.000000e+00> : vector<16x96xf32>
    %112 = tpu.matmul %111, %110, %cst_134 {dimension_numbers = #tpu.dot_dimension_numbers<[1], [0], [0], [1], [0, 0, 1, 1], [], []>} : vector<16x32xbf16>, vector<32x96xbf16>, vector<16x96xf32> -> vector<16x96xf32>
    %c0_135 = arith.constant 0 : index
    %c0_136 = arith.constant 0 : index
    %113 = vector.load %arg16[%c0_135, %c0_136] : memref<1x96xf32, #tpu.memory_space<vmem>>, vector<1x96xf32>
    %114 = vector.broadcast %113 : vector<1x96xf32> to vector<16x96xf32>
    %115 = arith.addf %112, %114 : vector<16x96xf32>
    %116 = vector.extract_strided_slice %115 {offsets = [0, 0], sizes = [16, 32], strides = [1, 1]} : vector<16x96xf32> to vector<16x32xf32>
    %117 = vector.extract_strided_slice %115 {offsets = [0, 32], sizes = [16, 32], strides = [1, 1]} : vector<16x96xf32> to vector<16x32xf32>
    %118 = vector.extract_strided_slice %115 {offsets = [0, 64], sizes = [16, 32], strides = [1, 1]} : vector<16x96xf32> to vector<16x32xf32>
    %c0_137 = arith.constant 0 : index
    %c0_138 = arith.constant 0 : index
    %119 = vector.load %arg17[%c0_137, %c0_138] : memref<32x32xbf16, #tpu.memory_space<vmem>>, vector<32x32xbf16>
    %120 = vector.extract_strided_slice %116 {offsets = [0, 0], sizes = [16, 8], strides = [1, 1]} : vector<16x32xf32> to vector<16x8xf32>
    %121 = arith.truncf %120 : vector<16x8xf32> to vector<16x8xbf16>
    %122 = vector.extract_strided_slice %117 {offsets = [0, 0], sizes = [16, 8], strides = [1, 1]} : vector<16x32xf32> to vector<16x8xf32>
    %123 = arith.truncf %122 : vector<16x8xf32> to vector<16x8xbf16>
    %cst_139 = arith.constant dense<0.000000e+00> : vector<16x16xf32>
    %124 = tpu.matmul %121, %123, %cst_139 {dimension_numbers = #tpu.dot_dimension_numbers<[1], [1], [0], [0], [0, 0, 1, 0], [], []>} : vector<16x8xbf16>, vector<16x8xbf16>, vector<16x16xf32> -> vector<16x16xf32>
    %cst_140 = arith.constant 0.353553385 : f32
    %125 = vector.broadcast %cst_140 : f32 to vector<16x16xf32>
    %126 = arith.mulf %124, %125 : vector<16x16xf32>
    %cst_141 = arith.constant dense<0xFF800000> : vector<16xf32>
    %127 = vector.multi_reduction <maximumf>, %126, %cst_141 [1] : vector<16x16xf32> to vector<16xf32>
    %128 = vector.shape_cast %127 : vector<16xf32> to vector<16x1xf32>
    %129 = vector.broadcast %128 : vector<16x1xf32> to vector<16x16xf32>
    %130 = arith.subf %126, %129 : vector<16x16xf32>
    %131 = math.exp %130 : vector<16x16xf32>
    %cst_142 = arith.constant dense<0.000000e+00> : vector<16xf32>
    %132 = vector.multi_reduction <add>, %131, %cst_142 [1] : vector<16x16xf32> to vector<16xf32>
    %133 = vector.shape_cast %132 : vector<16xf32> to vector<16x1xf32>
    %134 = tpu.reciprocal %133 {approx = true} : vector<16x1xf32> -> vector<16x1xf32>
    %135 = vector.broadcast %134 : vector<16x1xf32> to vector<16x16xf32>
    %136 = arith.mulf %131, %135 : vector<16x16xf32>
    %137 = vector.extract_strided_slice %118 {offsets = [0, 0], sizes = [16, 8], strides = [1, 1]} : vector<16x32xf32> to vector<16x8xf32>
    %138 = arith.truncf %136 : vector<16x16xf32> to vector<16x16xbf16>
    %139 = arith.truncf %137 : vector<16x8xf32> to vector<16x8xbf16>
    %cst_143 = arith.constant dense<0.000000e+00> : vector<16x8xf32>
    %140 = tpu.matmul %138, %139, %cst_143 {dimension_numbers = #tpu.dot_dimension_numbers<[1], [0], [0], [1], [0, 0, 1, 1], [], []>} : vector<16x16xbf16>, vector<16x8xbf16>, vector<16x8xf32> -> vector<16x8xf32>
    %141 = vector.extract_strided_slice %119 {offsets = [0, 0], sizes = [8, 32], strides = [1, 1]} : vector<32x32xbf16> to vector<8x32xbf16>
    %142 = arith.truncf %140 : vector<16x8xf32> to vector<16x8xbf16>
    %cst_144 = arith.constant dense<0.000000e+00> : vector<16x32xf32>
    %143 = tpu.matmul %142, %141, %cst_144 {dimension_numbers = #tpu.dot_dimension_numbers<[1], [0], [0], [1], [0, 0, 1, 1], [], []>} : vector<16x8xbf16>, vector<8x32xbf16>, vector<16x32xf32> -> vector<16x32xf32>
    %144 = vector.extract_strided_slice %116 {offsets = [0, 8], sizes = [16, 8], strides = [1, 1]} : vector<16x32xf32> to vector<16x8xf32>
    %145 = arith.truncf %144 : vector<16x8xf32> to vector<16x8xbf16>
    %146 = vector.extract_strided_slice %117 {offsets = [0, 8], sizes = [16, 8], strides = [1, 1]} : vector<16x32xf32> to vector<16x8xf32>
    %147 = arith.truncf %146 : vector<16x8xf32> to vector<16x8xbf16>
    %cst_145 = arith.constant dense<0.000000e+00> : vector<16x16xf32>
    %148 = tpu.matmul %145, %147, %cst_145 {dimension_numbers = #tpu.dot_dimension_numbers<[1], [1], [0], [0], [0, 0, 1, 0], [], []>} : vector<16x8xbf16>, vector<16x8xbf16>, vector<16x16xf32> -> vector<16x16xf32>
    %cst_146 = arith.constant 0.353553385 : f32
    %149 = vector.broadcast %cst_146 : f32 to vector<16x16xf32>
    %150 = arith.mulf %148, %149 : vector<16x16xf32>
    %cst_147 = arith.constant dense<0xFF800000> : vector<16xf32>
    %151 = vector.multi_reduction <maximumf>, %150, %cst_147 [1] : vector<16x16xf32> to vector<16xf32>
    %152 = vector.shape_cast %151 : vector<16xf32> to vector<16x1xf32>
    %153 = vector.broadcast %152 : vector<16x1xf32> to vector<16x16xf32>
    %154 = arith.subf %150, %153 : vector<16x16xf32>
    %155 = math.exp %154 : vector<16x16xf32>
    %cst_148 = arith.constant dense<0.000000e+00> : vector<16xf32>
    %156 = vector.multi_reduction <add>, %155, %cst_148 [1] : vector<16x16xf32> to vector<16xf32>
    %157 = vector.shape_cast %156 : vector<16xf32> to vector<16x1xf32>
    %158 = tpu.reciprocal %157 {approx = true} : vector<16x1xf32> -> vector<16x1xf32>
    %159 = vector.broadcast %158 : vector<16x1xf32> to vector<16x16xf32>
    %160 = arith.mulf %155, %159 : vector<16x16xf32>
    %161 = vector.extract_strided_slice %118 {offsets = [0, 8], sizes = [16, 8], strides = [1, 1]} : vector<16x32xf32> to vector<16x8xf32>
    %162 = arith.truncf %160 : vector<16x16xf32> to vector<16x16xbf16>
    %163 = arith.truncf %161 : vector<16x8xf32> to vector<16x8xbf16>
    %cst_149 = arith.constant dense<0.000000e+00> : vector<16x8xf32>
    %164 = tpu.matmul %162, %163, %cst_149 {dimension_numbers = #tpu.dot_dimension_numbers<[1], [0], [0], [1], [0, 0, 1, 1], [], []>} : vector<16x16xbf16>, vector<16x8xbf16>, vector<16x8xf32> -> vector<16x8xf32>
    %165 = vector.extract_strided_slice %119 {offsets = [8, 0], sizes = [8, 32], strides = [1, 1]} : vector<32x32xbf16> to vector<8x32xbf16>
    %166 = arith.truncf %164 : vector<16x8xf32> to vector<16x8xbf16>
    %cst_150 = arith.constant dense<0.000000e+00> : vector<16x32xf32>
    %167 = tpu.matmul %166, %165, %cst_150 {dimension_numbers = #tpu.dot_dimension_numbers<[1], [0], [0], [1], [0, 0, 1, 1], [], []>} : vector<16x8xbf16>, vector<8x32xbf16>, vector<16x32xf32> -> vector<16x32xf32>
    %168 = arith.addf %143, %167 : vector<16x32xf32>
    %169 = vector.extract_strided_slice %116 {offsets = [0, 16], sizes = [16, 8], strides = [1, 1]} : vector<16x32xf32> to vector<16x8xf32>
    %170 = arith.truncf %169 : vector<16x8xf32> to vector<16x8xbf16>
    %171 = vector.extract_strided_slice %117 {offsets = [0, 16], sizes = [16, 8], strides = [1, 1]} : vector<16x32xf32> to vector<16x8xf32>
    %172 = arith.truncf %171 : vector<16x8xf32> to vector<16x8xbf16>
    %cst_151 = arith.constant dense<0.000000e+00> : vector<16x16xf32>
    %173 = tpu.matmul %170, %172, %cst_151 {dimension_numbers = #tpu.dot_dimension_numbers<[1], [1], [0], [0], [0, 0, 1, 0], [], []>} : vector<16x8xbf16>, vector<16x8xbf16>, vector<16x16xf32> -> vector<16x16xf32>
    %cst_152 = arith.constant 0.353553385 : f32
    %174 = vector.broadcast %cst_152 : f32 to vector<16x16xf32>
    %175 = arith.mulf %173, %174 : vector<16x16xf32>
    %cst_153 = arith.constant dense<0xFF800000> : vector<16xf32>
    %176 = vector.multi_reduction <maximumf>, %175, %cst_153 [1] : vector<16x16xf32> to vector<16xf32>
    %177 = vector.shape_cast %176 : vector<16xf32> to vector<16x1xf32>
    %178 = vector.broadcast %177 : vector<16x1xf32> to vector<16x16xf32>
    %179 = arith.subf %175, %178 : vector<16x16xf32>
    %180 = math.exp %179 : vector<16x16xf32>
    %cst_154 = arith.constant dense<0.000000e+00> : vector<16xf32>
    %181 = vector.multi_reduction <add>, %180, %cst_154 [1] : vector<16x16xf32> to vector<16xf32>
    %182 = vector.shape_cast %181 : vector<16xf32> to vector<16x1xf32>
    %183 = tpu.reciprocal %182 {approx = true} : vector<16x1xf32> -> vector<16x1xf32>
    %184 = vector.broadcast %183 : vector<16x1xf32> to vector<16x16xf32>
    %185 = arith.mulf %180, %184 : vector<16x16xf32>
    %186 = vector.extract_strided_slice %118 {offsets = [0, 16], sizes = [16, 8], strides = [1, 1]} : vector<16x32xf32> to vector<16x8xf32>
    %187 = arith.truncf %185 : vector<16x16xf32> to vector<16x16xbf16>
    %188 = arith.truncf %186 : vector<16x8xf32> to vector<16x8xbf16>
    %cst_155 = arith.constant dense<0.000000e+00> : vector<16x8xf32>
    %189 = tpu.matmul %187, %188, %cst_155 {dimension_numbers = #tpu.dot_dimension_numbers<[1], [0], [0], [1], [0, 0, 1, 1], [], []>} : vector<16x16xbf16>, vector<16x8xbf16>, vector<16x8xf32> -> vector<16x8xf32>
    %190 = vector.extract_strided_slice %119 {offsets = [16, 0], sizes = [8, 32], strides = [1, 1]} : vector<32x32xbf16> to vector<8x32xbf16>
    %191 = arith.truncf %189 : vector<16x8xf32> to vector<16x8xbf16>
    %cst_156 = arith.constant dense<0.000000e+00> : vector<16x32xf32>
    %192 = tpu.matmul %191, %190, %cst_156 {dimension_numbers = #tpu.dot_dimension_numbers<[1], [0], [0], [1], [0, 0, 1, 1], [], []>} : vector<16x8xbf16>, vector<8x32xbf16>, vector<16x32xf32> -> vector<16x32xf32>
    %193 = arith.addf %168, %192 : vector<16x32xf32>
    %194 = vector.extract_strided_slice %116 {offsets = [0, 24], sizes = [16, 8], strides = [1, 1]} : vector<16x32xf32> to vector<16x8xf32>
    %195 = arith.truncf %194 : vector<16x8xf32> to vector<16x8xbf16>
    %196 = vector.extract_strided_slice %117 {offsets = [0, 24], sizes = [16, 8], strides = [1, 1]} : vector<16x32xf32> to vector<16x8xf32>
    %197 = arith.truncf %196 : vector<16x8xf32> to vector<16x8xbf16>
    %cst_157 = arith.constant dense<0.000000e+00> : vector<16x16xf32>
    %198 = tpu.matmul %195, %197, %cst_157 {dimension_numbers = #tpu.dot_dimension_numbers<[1], [1], [0], [0], [0, 0, 1, 0], [], []>} : vector<16x8xbf16>, vector<16x8xbf16>, vector<16x16xf32> -> vector<16x16xf32>
    %cst_158 = arith.constant 0.353553385 : f32
    %199 = vector.broadcast %cst_158 : f32 to vector<16x16xf32>
    %200 = arith.mulf %198, %199 : vector<16x16xf32>
    %cst_159 = arith.constant dense<0xFF800000> : vector<16xf32>
    %201 = vector.multi_reduction <maximumf>, %200, %cst_159 [1] : vector<16x16xf32> to vector<16xf32>
    %202 = vector.shape_cast %201 : vector<16xf32> to vector<16x1xf32>
    %203 = vector.broadcast %202 : vector<16x1xf32> to vector<16x16xf32>
    %204 = arith.subf %200, %203 : vector<16x16xf32>
    %205 = math.exp %204 : vector<16x16xf32>
    %cst_160 = arith.constant dense<0.000000e+00> : vector<16xf32>
    %206 = vector.multi_reduction <add>, %205, %cst_160 [1] : vector<16x16xf32> to vector<16xf32>
    %207 = vector.shape_cast %206 : vector<16xf32> to vector<16x1xf32>
    %208 = tpu.reciprocal %207 {approx = true} : vector<16x1xf32> -> vector<16x1xf32>
    %209 = vector.broadcast %208 : vector<16x1xf32> to vector<16x16xf32>
    %210 = arith.mulf %205, %209 : vector<16x16xf32>
    %211 = vector.extract_strided_slice %118 {offsets = [0, 24], sizes = [16, 8], strides = [1, 1]} : vector<16x32xf32> to vector<16x8xf32>
    %212 = arith.truncf %210 : vector<16x16xf32> to vector<16x16xbf16>
    %213 = arith.truncf %211 : vector<16x8xf32> to vector<16x8xbf16>
    %cst_161 = arith.constant dense<0.000000e+00> : vector<16x8xf32>
    %214 = tpu.matmul %212, %213, %cst_161 {dimension_numbers = #tpu.dot_dimension_numbers<[1], [0], [0], [1], [0, 0, 1, 1], [], []>} : vector<16x16xbf16>, vector<16x8xbf16>, vector<16x8xf32> -> vector<16x8xf32>
    %215 = vector.extract_strided_slice %119 {offsets = [24, 0], sizes = [8, 32], strides = [1, 1]} : vector<32x32xbf16> to vector<8x32xbf16>
    %216 = arith.truncf %214 : vector<16x8xf32> to vector<16x8xbf16>
    %cst_162 = arith.constant dense<0.000000e+00> : vector<16x32xf32>
    %217 = tpu.matmul %216, %215, %cst_162 {dimension_numbers = #tpu.dot_dimension_numbers<[1], [0], [0], [1], [0, 0, 1, 1], [], []>} : vector<16x8xbf16>, vector<8x32xbf16>, vector<16x32xf32> -> vector<16x32xf32>
    %218 = arith.addf %193, %217 : vector<16x32xf32>
    %c0_163 = arith.constant 0 : index
    %c0_164 = arith.constant 0 : index
    %219 = vector.load %arg18[%c0_163, %c0_164] : memref<1x32xf32, #tpu.memory_space<vmem>>, vector<1x32xf32>
    %220 = vector.broadcast %219 : vector<1x32xf32> to vector<16x32xf32>
    %221 = arith.addf %218, %220 : vector<16x32xf32>
    %cst_165 = arith.constant dense<0xFF800000> : vector<32xf32>
    %222 = vector.multi_reduction <maximumf>, %221, %cst_165 [0] : vector<16x32xf32> to vector<32xf32>
    %223 = vector.shape_cast %222 : vector<32xf32> to vector<1x32xf32>
    %c0_166 = arith.constant 0 : index
    %c0_167 = arith.constant 0 : index
    %224 = vector.load %arg19[%c0_166, %c0_167] : memref<32x5xbf16, #tpu.memory_space<vmem>>, vector<32x5xbf16>
    %225 = arith.truncf %223 : vector<1x32xf32> to vector<1x32xbf16>
    %cst_168 = arith.constant dense<0.000000e+00> : vector<1x5xf32>
    %226 = tpu.matmul %225, %224, %cst_168 {dimension_numbers = #tpu.dot_dimension_numbers<[1], [0], [0], [1], [0, 0, 1, 1], [], []>} : vector<1x32xbf16>, vector<32x5xbf16>, vector<1x5xf32> -> vector<1x5xf32>
    %c0_169 = arith.constant 0 : index
    %c0_170 = arith.constant 0 : index
    %227 = vector.load %arg20[%c0_169, %c0_170] : memref<1x5xf32, #tpu.memory_space<vmem>>, vector<1x5xf32>
    %228 = arith.addf %226, %227 : vector<1x5xf32>
    %c0_171 = arith.constant 0 : index
    %c0_172 = arith.constant 0 : index
    %c0_173 = arith.constant 0 : index
    %229 = vector.load %arg21[%c0_171, %c0_172, %c0_173] : memref<1x1x5xf32, #tpu.memory_space<vmem>>, vector<1x1x5xf32>
    %230 = vector.shape_cast %229 : vector<1x1x5xf32> to vector<1x5xf32>
    %231 = vector.shape_cast %228 : vector<1x5xf32> to vector<1x1x5xf32>
    tpu.vector_store %arg21[%c0_171, %c0_172, %c0_173], %231 {strides = array<i32>} : memref<1x1x5xf32, #tpu.memory_space<vmem>>, vector<1x1x5xf32>,
    return
  }
  func.func @transform_0(%arg0: i32) -> (i32, i32, i32) {
    %c0_i32 = arith.constant 0 : i32
    %c0_i32_0 = arith.constant 0 : i32
    %c0_i32_1 = arith.constant 0 : i32
    return %arg0, %c0_i32, %c0_i32_0 : i32, i32, i32
  }
  func.func @transform_1(%arg0: i32) -> (i32, i32) {
    %c0_i32 = arith.constant 0 : i32
    %c0_i32_0 = arith.constant 0 : i32
    %c0_i32_1 = arith.constant 0 : i32
    return %c0_i32, %c0_i32_0 : i32, i32
  }
  func.func @transform_2(%arg0: i32) -> (i32, i32) {
    %c0_i32 = arith.constant 0 : i32
    %c0_i32_0 = arith.constant 0 : i32
    %c0_i32_1 = arith.constant 0 : i32
    return %c0_i32, %c0_i32_0 : i32, i32
  }
  func.func @transform_3(%arg0: i32) -> (i32, i32) {
    %c0_i32 = arith.constant 0 : i32
    %c0_i32_0 = arith.constant 0 : i32
    %c0_i32_1 = arith.constant 0 : i32
    return %c0_i32, %c0_i32_0 : i32, i32
  }
  func.func @transform_4(%arg0: i32) -> (i32, i32) {
    %c0_i32 = arith.constant 0 : i32
    %c0_i32_0 = arith.constant 0 : i32
    %c0_i32_1 = arith.constant 0 : i32
    return %c0_i32, %c0_i32_0 : i32, i32
  }
  func.func @transform_5(%arg0: i32) -> (i32, i32) {
    %c0_i32 = arith.constant 0 : i32
    %c0_i32_0 = arith.constant 0 : i32
    %c0_i32_1 = arith.constant 0 : i32
    return %c0_i32, %c0_i32_0 : i32, i32
  }
  func.func @transform_6(%arg0: i32) -> (i32, i32) {
    %c0_i32 = arith.constant 0 : i32
    %c0_i32_0 = arith.constant 0 : i32
    %c0_i32_1 = arith.constant 0 : i32
    return %c0_i32, %c0_i32_0 : i32, i32
  }
  func.func @transform_7(%arg0: i32) -> (i32, i32) {
    %c0_i32 = arith.constant 0 : i32
    %c0_i32_0 = arith.constant 0 : i32
    %c0_i32_1 = arith.constant 0 : i32
    return %c0_i32, %c0_i32_0 : i32, i32
  }
  func.func @transform_8(%arg0: i32) -> (i32, i32) {
    %c0_i32 = arith.constant 0 : i32
    %c0_i32_0 = arith.constant 0 : i32
    %c0_i32_1 = arith.constant 0 : i32
    return %c0_i32, %c0_i32_0 : i32, i32
  }
  func.func @transform_9(%arg0: i32) -> (i32, i32) {
    %c0_i32 = arith.constant 0 : i32
    %c0_i32_0 = arith.constant 0 : i32
    %c0_i32_1 = arith.constant 0 : i32
    return %c0_i32, %c0_i32_0 : i32, i32
  }
  func.func @transform_10(%arg0: i32) -> (i32, i32) {
    %c0_i32 = arith.constant 0 : i32
    %c0_i32_0 = arith.constant 0 : i32
    %c0_i32_1 = arith.constant 0 : i32
    return %c0_i32, %c0_i32_0 : i32, i32
  }
  func.func @transform_11(%arg0: i32) -> (i32, i32) {
    %c0_i32 = arith.constant 0 : i32
    %c0_i32_0 = arith.constant 0 : i32
    %c0_i32_1 = arith.constant 0 : i32
    return %c0_i32, %c0_i32_0 : i32, i32
  }
  func.func @transform_12(%arg0: i32) -> (i32, i32) {
    %c0_i32 = arith.constant 0 : i32
    %c0_i32_0 = arith.constant 0 : i32
    %c0_i32_1 = arith.constant 0 : i32
    return %c0_i32, %c0_i32_0 : i32, i32
  }
  func.func @transform_13(%arg0: i32) -> (i32, i32) {
    %c0_i32 = arith.constant 0 : i32
    %c0_i32_0 = arith.constant 0 : i32
    %c0_i32_1 = arith.constant 0 : i32
    return %c0_i32, %c0_i32_0 : i32, i32
  }
  func.func @transform_14(%arg0: i32) -> (i32, i32) {
    %c0_i32 = arith.constant 0 : i32
    %c0_i32_0 = arith.constant 0 : i32
    %c0_i32_1 = arith.constant 0 : i32
    return %c0_i32, %c0_i32_0 : i32, i32
  }
  func.func @transform_15(%arg0: i32) -> (i32, i32) {
    %c0_i32 = arith.constant 0 : i32
    %c0_i32_0 = arith.constant 0 : i32
    %c0_i32_1 = arith.constant 0 : i32
    return %c0_i32, %c0_i32_0 : i32, i32
  }
  func.func @transform_16(%arg0: i32) -> (i32, i32) {
    %c0_i32 = arith.constant 0 : i32
    %c0_i32_0 = arith.constant 0 : i32
    %c0_i32_1 = arith.constant 0 : i32
    return %c0_i32, %c0_i32_0 : i32, i32
  }
  func.func @transform_17(%arg0: i32) -> (i32, i32) {
    %c0_i32 = arith.constant 0 : i32
    %c0_i32_0 = arith.constant 0 : i32
    %c0_i32_1 = arith.constant 0 : i32
    return %c0_i32, %c0_i32_0 : i32, i32
  }
  func.func @transform_18(%arg0: i32) -> (i32, i32) {
    %c0_i32 = arith.constant 0 : i32
    %c0_i32_0 = arith.constant 0 : i32
    %c0_i32_1 = arith.constant 0 : i32
    return %c0_i32, %c0_i32_0 : i32, i32
  }
  func.func @transform_19(%arg0: i32) -> (i32, i32) {
    %c0_i32 = arith.constant 0 : i32
    %c0_i32_0 = arith.constant 0 : i32
    %c0_i32_1 = arith.constant 0 : i32
    return %c0_i32, %c0_i32_0 : i32, i32
  }
  func.func @transform_20(%arg0: i32) -> (i32, i32, i32) {
    %c0_i32 = arith.constant 0 : i32
    %c0_i32_0 = arith.constant 0 : i32
    %c0_i32_1 = arith.constant 0 : i32
    return %arg0, %c0_i32, %c0_i32_0 : i32, i32, i32
  }
}

</mosaic_0001>

<bundles_post_ra>
// kernel: tpu_custom_call.1
= control target key start
LH: loop header
LB: loop body
LE: loop exit
PB: predicated region body
PF: predicated region fallthrough
CT: control target
= control target key end

     0   :  { %s3863_s0 = inlined_call_operand.vmem [shape: f32[2,64,8], index: 0, kind: input, shape index: {}]   ;;  %s3864_s1 = inlined_call_operand.vmem [shape: bf16[56,16], index: 1, kind: input, shape index: {}]   ;;  %s3865_s2 = inlined_call_operand.vmem [shape: f32[1,16], index: 2, kind: input, shape index: {}]   ;;  %s3866_s3 = inlined_call_operand.vmem [shape: bf16[112,16], index: 3, kind: input, shape index: {}]   ;;  %s3867_s4 = inlined_call_operand.vmem [shape: f32[1,16], index: 4, kind: input, shape index: {}]   ;;  %s3868_s5 = inlined_call_operand.vmem [shape: bf16[112,16], index: 5, kind: input, shape index: {}]   ;;  %s3869_s6 = inlined_call_operand.vmem [shape: f32[1,16], index: 6, kind: input, shape index: {}]   ;;  %s3870_s7 = inlined_call_operand.vmem [shape: f32[1,16], index: 7, kind: input, shape index: {}]   ;;  %s3871_s8 = inlined_call_operand.vmem [shape: bf16[112,32], index: 8, kind: input, shape index: {}]   ;;  %s3872_s9 = inlined_call_operand.vmem [shape: f32[1,32], index: 9, kind: input, shape index: {}]   ;;  %s3873_s10 = inlined_call_operand.vmem [shape: bf16[224,32], index: 10, kind: input, shape index: {}]   ;;  %s3874_s11 = inlined_call_operand.vmem [shape: f32[1,32], index: 11, kind: input, shape index: {}]   ;;  %s3875_s12 = inlined_call_operand.vmem [shape: f32[1,32], index: 12, kind: input, shape index: {}]   ;;  %s3876_s13 = inlined_call_operand.vmem [shape: bf16[16,32], index: 13, kind: input, shape index: {}]   ;;  %s3877_s14 = inlined_call_operand.vmem [shape: bf16[32,96], index: 14, kind: input, shape index: {}]   ;;  %s3878_s15 = inlined_call_operand.vmem [shape: f32[1,96], index: 15, kind: input, shape index: {}]   ;;  %s3879_s16 = inlined_call_operand.vmem [shape: bf16[32,32], index: 16, kind: input, shape index: {}]   ;;  %s3880_s17 = inlined_call_operand.vmem [shape: f32[1,32], index: 17, kind: input, shape index: {}]   ;;  %s3881_s18 = inlined_call_operand.vmem [shape: bf16[32,5], index: 18, kind: input, shape index: {}]   ;;  %s3882_s19 = inlined_call_operand.vmem [shape: f32[1,5], index: 19, kind: input, shape index: {}]   ;;  %s3883_s20 = inlined_call_operand.hbm [shape: f32[2,1,5], index: 20, kind: output, shape index: {}]  }
   0x1   :  { %3911 = sst [smem:[#allocation14_spill]] %s3863_s0 }
   0x2   :  { %3912 = sst [smem:[#allocation15_spill]] %s3864_s1 }
   0x3   :  { %3913 = sst [smem:[#allocation16_spill]] %s3865_s2 }
   0x4   :  { %3914 = sst [smem:[#allocation17_spill]] %s3866_s3 }
   0x5   :  { %3915 = sst [smem:[#allocation18_spill]] %s3867_s4 }
   0x6   :  { %3916 = sst [smem:[#allocation19_spill]] %s3882_s19 }
   0x7   :  { %3917 = sst [smem:[#allocation20_spill]] %s3883_s20 }
   0x8   :  { %25 = vsyncpa [#allocation4], 0 }
   0x9   :  { %27 = vsyncpa [#allocation4 + $0x1], 0  ;;  %s3261_s1 = smov 0   ;;  %s3263_s22 = smov 0  }
   0xa   :  { %s3265_s23 = smov 0   ;;  %s3267_s24 = smov 0  }
   0xb LB: > { %3918 = sst [smem:[#allocation6_spill]] %s3126_s1  ;;  %s3282_s2 = sadd.s32 4294967295, %s3138_s24   ;;  %s3138_s24 = sphi %s3267_s24, %s3947_s24   ;;  %s3134_s23 = sphi %s3265_s23, %s3949_s23   ;;  %s3130_s22 = sphi %s3263_s22, %s3951_s22   ;;  %s3126_s1 = sphi %s3261_s1, %s3950_s1  }
   0xc   : > { %3919 = sst [smem:[#allocation7_spill]] %s3134_s23  ;;  %s2467_s25 = sadd.s32 4294967294, %s3138_s24  }
   0xd   : > { %3920 = sst [smem:[#allocation8_spill]] %s3138_s24  ;;  %s3286_s3 = sadd.s32 1, %s3138_s24  }
   0xe   : > { %3921 = sst [smem:[#allocation9_spill]] %s3282_s2  ;;  %s465_s26 = sadd.s32 1, %s3134_s23 }
   0xf   : > { %3922 = sst [smem:[#allocation10_spill]] %s3286_s3  ;;  %s462_s27 = ssub.s32 %s3138_s24, %s3286_s3 }
  0x10   : > { %p475_p0 = scmp.ne.s32.totalorder %s3134_s23, %s3130_s22  ;;  %p463_p1 = scmp.eq.s32.totalorder %s462_s27, 0 }
  0x11   : > { %p476_p2 = scmp.eq.s32.totalorder %s3282_s2, 1  ;;  %p481_p3 = scmp.ne.s32.totalorder %s3130_s22, %s3126_s1 }
  0x12   : > { %p482_p4 = scmp.eq.s32.totalorder %s2467_s25, 1  ;;  %p2470_p7 = scmp.ge.s32.totalorder %s3138_s24, 1 }
  0x13   : > { %s3297_s28 = scalar_select %p463_p1, %s3134_s23, %s465_s26  }
  0x14   : > { %p3299_p5 = por %p476_p2, %p475_p0  ;;  %p3303_p6 = por %p482_p4, %p481_p3 }
  0x15   : > { %3923 = sst [smem:[#allocation11_spill]] %s3297_s28  ;;  %p565_p8 = scmp.lt.s32.totalorder %s3138_s24, 3 }
  0x16   : > { %s3924_s4 = scalar_select %p3299_p5, 1, 0 }
  0x17   : > { %s3926_s29 = scalar_select %p3303_p6, 1, 0 }
  0x18   : > { %3925 = sst [smem:[#allocation12_spill]] %s3924_s4  ;;  %p566_p9 = pnand %p2470_p7, %p565_p8 }
  0x19   : > { %3927 = sst [smem:[#allocation13_spill]] %s3926_s29  ;;  %p622_p10 = scmp.lt.s32.totalorder (!%p566_p9), %s3282_s2, 1 }
  0x1a   : > { %569 = sbr.rel (%p566_p9) target bundleno = 3130 (0xc3a), region = 100  ;;  %s3928_s26 = sld [smem:[#allocation14_spill]] (!%p566_p9) }
  0x1b   : > { %s3889_s21 = smov (!%p566_p9), 40   ;;  %s3887_s25 = smov (!%p566_p9), 16  }
  0x1c   : > { %s3932_s23 = smov (!%p566_p9), 16   ;;  %s3900_s28 = smov (!%p566_p9), 96  }
  0x1d   : > { %s3934_s4 = sld [smem:[#allocation18_spill]] (!%p566_p9)  ;;  %s3939_s3 = smov (!%p566_p9), 40  }
  0x1e   : > { %s3940_s24 = sld [smem:[#allocation9_spill]] (!%p566_p9) }
  0x1f   : > { %v3140_v0 = vmov 0.0   ;;  %s623_s30 = scalar_select %p622_p10, %s3282_s2, 1  ;;  %vm653_vm0 = vcmask 64512   ;;  %vm875_vm1 = vcmask 1043456   ;;  %vm817_vm2 = vcmask 130048  }
  0x20   : > { %644 = vst [vmem:[#allocation2] sm:$0xff] %v3140_v0  ;;  %vm822_vm3 = vcmask 195584   ;;  %vm827_vm4 = vcmask 261120   ;;  %vm832_vm5 = vcmask 326656   ;;  %vm837_vm6 = vcmask 392192   ;;  %s3151_s2 = smov 88  }
  0x21   : > { %645 = vst [vmem:[#allocation2 + $0x8] sm:$0xff] %v3140_v0  ;;  %s2671_s0 = sshll.u32 %s623_s30, 6  ;;  %s3141_s30 = smov 8   ;;  %vm868_vm7 = vcmask 457728   ;;  %vm1062_vm8 = vcmask 523264   ;;  %vm1067_vm9 = vcmask 654336  }
  0x22   : > { %646 = vst [vmem:[#allocation2 + $0x10] sm:$0xff] %v3140_v0  ;;  %s626_s27 = scalar_lea.vmem %s3928_s26, %s2671_s0  ;;  %s3142_s0 = smov 24   ;;  %vm1072_vm10 = vcmask 785408   ;;  %vm1124_vm11 = vcmask 916480   ;;  %vm2397_vm12 = vcmask 32768  }
  0x23   : > { %647 = vst [vmem:[#allocation2 + $0x18] sm:$0xff] %v3140_v0  ;;  %v628_v1 = vld [vmem:[%s626_s27] sm:$0xff]  ;;  %v629_v2 = vld [vmem:[%s626_s27 + $0x8] sm:$0xff]  ;;  %v630_v3 = vld [vmem:[%s626_s27 + $0x10] sm:$0xff]  ;;  %s3890_s26 = smov 32  }
  0x24   : > { %648 = vst [vmem:[#allocation2 + $0x20] sm:$0xff] %v3140_v0  ;;  %v631_v4 = vld [vmem:[%s626_s27 + $0x18] sm:$0xff]  ;;  %v632_v5 = vld [vmem:[%s626_s27 + $0x20] sm:$0xff]  ;;  %v633_v8 = vld [vmem:[%s626_s27 + $0x28] sm:$0xff] }
  0x25   : > { %649 = vst [vmem:[#allocation2 + $0x28] sm:$0xff] %v3140_v0  ;;  %v634_v9 = vld [vmem:[%s626_s27 + $0x30] sm:$0xff]  ;;  %v635_v12 = vld [vmem:[%s626_s27 + $0x38] sm:$0xff]  ;;  %s3892_s27 = smov 48  }
  0x26   : > { %654 = vst.msk [vmem:[#allocation2 + $0x3] sm:$0xff] %vm653_vm0, %v628_v1 }
  0x27   : > { %655 = vst.msk [vmem:[#allocation2 + $0xb] sm:$0xff] %vm653_vm0, %v629_v2 }
  0x28   : > { %656 = vst.msk [vmem:[#allocation2 + $0x13] sm:$0xff] %vm653_vm0, %v630_v3 }
  0x29   : > { %657 = vst.msk [vmem:[#allocation2 + $0x1b] sm:$0xff] %vm653_vm0, %v631_v4 }
  0x2a   : > { %650 = vst [vmem:[#allocation2 + $0x30] sm:$0xff] %v3140_v0 }
  0x2b   : > { %651 = vst [vmem:[#allocation2 + $0x38] sm:$0xff] %v3140_v0 }
  0x2c   : > { %652 = vst [vmem:[#allocation2 + $0x40] sm:$0xff] %v3140_v0 }
  0x2d   : > { %658 = vst.msk [vmem:[#allocation2 + $0x23] sm:$0xff] %vm653_vm0, %v632_v5 }
  0x2e   : > { %v670_v6 = vld [vmem:[#allocation2 + $0x1] ss:$2 sm:$0xff]  ;;  %659 = vst.msk [vmem:[#allocation2 + $0x2b] sm:$0xff] %vm653_vm0, %v633_v8  ;;  %v678_v17 = vld [vmem:[#allocation2 + $0x2] ss:$2 sm:$0xff] }
  0x2f   : > { %v686_v7 = vld [vmem:[#allocation2 + $0x3] ss:$2 sm:$0xff]  ;;  %v710_v16 = vld [vmem:[#allocation2 + $0x6] ss:$2 sm:$0xff]  ;;  %660 = vst.msk [vmem:[#allocation2 + $0x33] sm:$0xff] %vm653_vm0, %v634_v9 }
  0x30   : > { %v672_v10 = vld [vmem:[#allocation2 + $0x11] ss:$2 sm:$0xff]  ;;  %v694_v18 = vld [vmem:[#allocation2 + $0x4] ss:$2 sm:$0xff]  ;;  %v696_v20 = vld [vmem:[#allocation2 + $0x14] ss:$2 sm:$0xff] }
  0x31   : > { %v688_v11 = vld [vmem:[#allocation2 + $0x13] ss:$2 sm:$0xff]  ;;  %v2770_v14 = vpack.i.bf16 %v672_v10, %v670_v6  ;;  %v680_v19 = vld [vmem:[#allocation2 + $0x12] ss:$2 sm:$0xff]  ;;  %661 = vst.msk [vmem:[#allocation2 + $0x3b] sm:$0xff] %vm653_vm0, %v635_v12  ;;  %v2785_v26 = vpack.i.bf16 %v696_v20, %v694_v18 }
  0x32   : > { %v702_v13 = vld [vmem:[#allocation2 + $0x5] ss:$2 sm:$0xff]  ;;  %v2780_v15 = vpack.i.bf16 %v688_v11, %v686_v7  ;;  %v3333_v23 = vld [vmem:[#allocation2 + $0x10] ss:$2 sm:$0xff]  ;;  %v2775_v25 = vpack.i.bf16 %v680_v19, %v678_v17  ;;  %v662_v49 = vld [vmem:[#allocation2] ss:$2 sm:$0xff] }
  0x33   : > { %2771 = vrot.lane.b32.xlu0 %v2770_v14, %s3141_s30  ;;  %913 = vst [vmem:[#allocation2] sm:$0xff] %v3140_v0 }
  0x34   : > { %2781 = vrot.lane.b32.xlu1 %v2780_v15, %s3142_s0  ;;  %v704_v21 = vld [vmem:[#allocation2 + $0x15] ss:$2 sm:$0xff]  ;;  %v712_v22 = vld [vmem:[#allocation2 + $0x16] ss:$2 sm:$0xff]  ;;  %914 = vst [vmem:[#allocation2 + $0x8] sm:$0xff] %v3140_v0 }
  0x35   : > { %v2790_v24 = vpack.i.bf16 %v704_v21, %v702_v13  ;;  %915 = vst [vmem:[#allocation2 + $0x10] sm:$0xff] %v3140_v0  ;;  %v674_v27 = vld [vmem:[#allocation2 + $0x21] ss:$2 sm:$0xff]  ;;  %v2795_v31 = vpack.i.bf16 %v712_v22, %v710_v16  ;;  %v682_v35 = vld [vmem:[#allocation2 + $0x22] ss:$2 sm:$0xff] }
  0x36   : > { %916 = vst [vmem:[#allocation2 + $0x18] sm:$0xff] %v3140_v0  ;;  %v690_v38 = vld [vmem:[#allocation2 + $0x23] ss:$2 sm:$0xff]  ;;  %v698_v40 = vld [vmem:[#allocation2 + $0x24] ss:$2 sm:$0xff] }
  0x37   : > { %2791 = vrot.lane.b32.xlu2 %v2790_v24, %s3889_s21  ;;  %v706_v41 = vld [vmem:[#allocation2 + $0x25] ss:$2 sm:$0xff]  ;;  %v714_v44 = vld [vmem:[#allocation2 + $0x26] ss:$2 sm:$0xff] }
  0x38   : > { %v684_v28 = vld [vmem:[#allocation2 + $0x32] ss:$2 sm:$0xff]  ;;  %v708_v30 = vld [vmem:[#allocation2 + $0x35] ss:$2 sm:$0xff] }
  0x39   : > { %v700_v29 = vld [vmem:[#allocation2 + $0x34] ss:$2 sm:$0xff]  ;;  %v692_v32 = vld [vmem:[#allocation2 + $0x33] ss:$2 sm:$0xff]  ;;  %v2805_v37 = vpack.i.bf16 %v684_v28, %v682_v35  ;;  %v2820_v43 = vpack.i.bf16 %v708_v30, %v706_v41 }
  0x3a   : > { %v716_v33 = vld [vmem:[#allocation2 + $0x36] ss:$2 sm:$0xff]  ;;  %v676_v34 = vld [vmem:[#allocation2 + $0x31] ss:$2 sm:$0xff]  ;;  %v2810_v39 = vpack.i.bf16 %v692_v32, %v690_v38  ;;  %v2815_v42 = vpack.i.bf16 %v700_v29, %v698_v40 }
  0x3b   : > { %2776 = vrot.lane.b32.xlu0 %v2775_v25, %s3887_s25  ;;  %1742 = vst [vmem:[#allocation2 + $0x40] sm:$0xff] %v3140_v0  ;;  %v2800_v36 = vpack.i.bf16 %v676_v34, %v674_v27  ;;  %v2825_v45 = vpack.i.bf16 %v716_v33, %v714_v44  ;;  %v666_v54 = vld [vmem:[#allocation2 + $0x20] ss:$2 sm:$0xff]  ;;  %v668_v55 = vld [vmem:[#allocation2 + $0x30] ss:$2 sm:$0xff] }
  0x3c   : > { %2786 = vrot.lane.b32.xlu1 %v2785_v26, %s3890_s26  ;;  %1739 = vst [vmem:[#allocation2 + $0x28] sm:$0xff] %v3140_v0 }
  0x3d   : > { %1740 = vst [vmem:[#allocation2 + $0x30] sm:$0xff] %v3140_v0 }
  0x3e   : > { %1741 = vst [vmem:[#allocation2 + $0x38] sm:$0xff] %v3140_v0 }
  0x3f   : > { %2796 = vrot.lane.b32.xlu2 %v2795_v31, %s3892_s27  ;;  %917 = vst [vmem:[#allocation2 + $0x20] sm:$0xff] %v3140_v0 }
  0x43   : > { %2801 = vrot.lane.b32.xlu0 %v2800_v36, %s3141_s30  ;;  %s3929_s30 = sld [smem:[#allocation15_spill]] }
  0x44   : > { %2806 = vrot.lane.b32.xlu1 %v2805_v37, %s3887_s25  ;;  %s3904_s25 = smov 64  }
  0x47   : > { %2811 = vrot.lane.b32.xlu2 %v2810_v39, %s3142_s0  ;;  %s3931_s0 = smov 32  }
  0x49   : > { %v642_v46 = vld [vmem:[%s3929_s30 + $0x18] sm:$0xf]  ;;  %v2674_v51 = vld [vmem:[%s3929_s30 + $0x10] sm:$0xff]  ;;  %v2673_v52 = vld [vmem:[%s3929_s30 + $0x8] sm:$0xff] }
  0x4a   : > { %v860_v47 = vunpack.c.l.b16 %v642_v46  ;;  %v2672_v53 = vld [vmem:[%s3929_s30] sm:$0xff]  ;;  %s3933_s30 = sld [smem:[#allocation17_spill]] }
  0x4b   : > { %2816 = vrot.lane.b32.xlu0 %v2815_v42, %s3890_s26  ;;  %s3930_s26 = sld [smem:[#allocation16_spill]] }
  0x4c   : > { %2821 = vrot.lane.b32.xlu1 %v2820_v43, %s3889_s21  ;;  %v864_v48 = vpack.c.b16 %v860_v47, %v860_v47  ;;  %s3906_s21 = smov 80  }
  0x4e   : > { %v877_v50 = vsel %vm875_vm1, %v864_v48, 0 }
  0x4f   : > { %2826 = vrot.lane.b32.xlu2 %v2825_v45, %s3892_s27  ;;  %883 = vmatpush.bf16.msra.mxu0 %v877_v50 }
  0x53   : > { %884 = vmatpush.bf16.msra.mxu0 %v2674_v51 }
  0x57   : > { %885 = vmatpush.bf16.msra.mxu0 %v2673_v52 }
  0x5b   : > { %886 = vmatpush.bf16.msra.mxu0 %v2672_v53 }
  0x91   : > { %v2792_v56 = vpop.permute.xlu2 %2791 }
  0x92   : > { %v2794_v62 = vunpack.i.h.bf16 %v2792_v56  ;;  %v2793_v15 = vunpack.i.l.bf16 %v2792_v56 }
  0x99   : > { %v2797_v59 = vpop.permute.xlu2 %2796 }
  0x9a   : > { %v2799_v12 = vunpack.i.h.bf16 %v2797_v59  ;;  %v2798_v13 = vunpack.i.l.bf16 %v2797_v59 }
  0xa1   : > { %v2812_v14 = vpop.permute.xlu2 %2811 }
  0xa2   : > { %v2814_v34 = vunpack.i.h.bf16 %v2812_v14  ;;  %v2813_v35 = vunpack.i.l.bf16 %v2812_v14 }
  0xa5   : > { %v2772_v57 = vpop.permute.xlu0 %2771 }
  0xa6   : > { %v2782_v58 = vpop.permute.xlu1 %2781  ;;  %v2774_v60 = vunpack.i.h.bf16 %v2772_v57  ;;  %v2773_v61 = vunpack.i.l.bf16 %v2772_v57 }
  0xa7   : > { %v2784_v8 = vunpack.i.h.bf16 %v2782_v58  ;;  %v2783_v9 = vunpack.i.l.bf16 %v2782_v58 }
  0xa8   : > { %v814_v6 = vsel %vm653_vm0, %v3333_v23, %v2774_v60  ;;  %v813_v7 = vsel %vm653_vm0, %v662_v49, %v2773_v61 }
  0xa9   : > { %v2827_v33 = vpop.permute.xlu2 %2826 }
  0xaa   : > { %v2829_v40 = vunpack.i.h.bf16 %v2827_v33  ;;  %v2828_v41 = vunpack.i.l.bf16 %v2827_v33 }
  0xad   : > { %v2777_v63 = vpop.permute.xlu0 %2776 }
  0xae   : > { %v2787_v1 = vpop.permute.xlu1 %2786  ;;  %v2779_v2 = vunpack.i.h.bf16 %v2777_v63  ;;  %v2778_v3 = vunpack.i.l.bf16 %v2777_v63 }
  0xaf   : > { %v2789_v4 = vunpack.i.h.bf16 %v2787_v1  ;;  %v2788_v5 = vunpack.i.l.bf16 %v2787_v1 }
  0xb0   : > { %v818_v10 = vsel %vm817_vm2, %v813_v7, %v2778_v3  ;;  %v819_v11 = vsel %vm817_vm2, %v814_v6, %v2779_v2 }
  0xb1   : > { %v823_v16 = vsel %vm822_vm3, %v818_v10, %v2783_v9  ;;  %v824_v17 = vsel %vm822_vm3, %v819_v11, %v2784_v8 }
  0xb2   : > { %v828_v18 = vsel %vm827_vm4, %v823_v16, %v2788_v5  ;;  %v829_v19 = vsel %vm827_vm4, %v824_v17, %v2789_v4 }
  0xb3   : > { %v833_v20 = vsel %vm832_vm5, %v828_v18, %v2793_v15  ;;  %v834_v21 = vsel %vm832_vm5, %v829_v19, %v2794_v62 }
  0xb4   : > { %v838_v22 = vsel %vm837_vm6, %v833_v20, %v2798_v13  ;;  %v839_v23 = vsel %vm837_vm6, %v834_v21, %v2799_v12 }
  0xb5   : > { %v2802_v24 = vpop.permute.xlu0 %2801  ;;  %v842_v26 = vpack.c.bf16 %v839_v23, %v838_v22 }
  0xb6   : > { %v2807_v25 = vpop.permute.xlu1 %2806  ;;  %v2804_v27 = vunpack.i.h.bf16 %v2802_v24  ;;  %v2803_v28 = vunpack.i.l.bf16 %v2802_v24 }
  0xb7   : > { %2485 = vmatmul.msk.bf16.vlgmr.msra.gmra.mxu0 %vm868_vm7, %v842_v26  ;;  %v2809_v29 = vunpack.i.h.bf16 %v2807_v25  ;;  %v2808_v30 = vunpack.i.l.bf16 %v2807_v25 }
  0xb8   : > { %v816_v31 = vsel %vm653_vm0, %v668_v55, %v2804_v27  ;;  %v815_v32 = vsel %vm653_vm0, %v666_v54, %v2803_v28  ;;  %v3035_v55 = vld [vmem:[%s3930_s26] ss:$0 sm:$0xff]  ;;  %s3155_s26 = smov 56  }
  0xb9   : > { %v820_v36 = vsel %vm817_vm2, %v815_v32, %v2808_v30  ;;  %v821_v37 = vsel %vm817_vm2, %v816_v31, %v2809_v29 }
  0xba   : > { %v825_v46 = vsel %vm822_vm3, %v820_v36, %v2813_v35  ;;  %v826_v47 = vsel %vm822_vm3, %v821_v37, %v2814_v34 }
  0xbd   : > { %v2817_v38 = vpop.permute.xlu0 %2816 }
  0xbe   : > { %v2822_v39 = vpop.permute.xlu1 %2821  ;;  %v2819_v42 = vunpack.i.h.bf16 %v2817_v38  ;;  %v2818_v43 = vunpack.i.l.bf16 %v2817_v38 }
  0xbf   : > { %v2824_v44 = vunpack.i.h.bf16 %v2822_v39  ;;  %v2823_v45 = vunpack.i.l.bf16 %v2822_v39 }
  0xc0   : > { %v830_v48 = vsel %vm827_vm4, %v825_v46, %v2818_v43  ;;  %v831_v49 = vsel %vm827_vm4, %v826_v47, %v2819_v42  ;;  %v2680_v42 = vld [vmem:[%s3933_s30 + $0x28] sm:$0xff]  ;;  %v2679_v43 = vld [vmem:[%s3933_s30 + $0x20] sm:$0xff] }
  0xc1   : > { %v835_v50 = vsel %vm832_vm5, %v830_v48, %v2823_v45  ;;  %v836_v51 = vsel %vm832_vm5, %v831_v49, %v2824_v44  ;;  %v2678_v44 = vld [vmem:[%s3933_s30 + $0x18] sm:$0xff]  ;;  %v2677_v45 = vld [vmem:[%s3933_s30 + $0x10] sm:$0xff]  ;;  %v2676_v46 = vld [vmem:[%s3933_s30 + $0x8] sm:$0xff] }
  0xc2   : > { %v840_v52 = vsel %vm837_vm6, %v835_v50, %v2828_v41  ;;  %v841_v53 = vsel %vm837_vm6, %v836_v51, %v2829_v40  ;;  %v2681_v41 = vld [vmem:[%s3933_s30 + $0x30] sm:$0xff]  ;;  %v2675_v47 = vld [vmem:[%s3933_s30] sm:$0xff]  ;;  %s3152_s30 = smov 104  }
  0xc3   : > { %v843_v54 = vpack.c.bf16 %v841_v53, %v840_v52  ;;  %1132 = vmatpush.bf16.msra.mxu1 %v2681_v41 }
  0xc7   : > { %2486 = vmatmul.msk.bf16.gmra.mxu0 %vm868_vm7, %v843_v54  ;;  %1133 = vmatpush.bf16.msra.mxu1 %v2680_v42 }
  0xcb   : > { %1134 = vmatpush.bf16.msra.mxu1 %v2679_v43 }
  0xcf   : > { %1135 = vmatpush.bf16.msra.mxu1 %v2678_v44 }
  0xd3   : > { %1136 = vmatpush.bf16.msra.mxu1 %v2677_v45 }
  0xd7   : > { %1137 = vmatpush.bf16.msra.mxu1 %v2676_v46 }
  0xdb   : > { %1138 = vmatpush.bf16.msra.mxu1 %v2675_v47 }
 0x134   : > { %v888_v56 = vpop.f32.mrf.mxu0 }
 0x135   : > { %v3397_v57 = vadd.f32 %v3035_v55, %v888_v56 }
 0x137   : > { %922 = vst.msk [vmem:[#allocation2 + $0x3] sm:$0xff] %vm817_vm2, %v3397_v57 }
 0x13c   : > { %v890_v58 = vpop.f32.mrf.mxu0 }
 0x13d   : > { %v3401_v59 = vadd.f32 %v3035_v55, %v890_v58 }
 0x13e   : > { %v938_v61 = vld [vmem:[#allocation2 + $0x3] sm:$0xff] }
 0x13f   : > { %923 = vst.msk [vmem:[#allocation2 + $0xb] sm:$0xff] %vm817_vm2, %v3401_v59  ;;  %v934_v63 = vld [vmem:[#allocation2 + $0x2] sm:$0xff] }
 0x140   : > { %v930_v1 = vld [vmem:[#allocation2 + $0x1] sm:$0xff] }
 0x141   : > { %v3407_v2 = vld [vmem:[#allocation2] sm:$0xff] }
 0x144   : > { %v893_v60 = vpop.f32.mrf.mxu0 }
 0x145   : > { %v3405_v62 = vadd.f32 %v3035_v55, %v893_v60 }
 0x146   : > { %v939_v3 = vld [vmem:[#allocation2 + $0xb] sm:$0xff] }
 0x147   : > { %v935_v4 = vld [vmem:[#allocation2 + $0xa] sm:$0xff]  ;;  %924 = vst.msk [vmem:[#allocation2 + $0x13] sm:$0xff] %vm817_vm2, %v3405_v62  ;;  %v2840_v6 = vpack.i.bf16 %v939_v3, %v938_v61 }
 0x148   : > { %v931_v5 = vld [vmem:[#allocation2 + $0x9] sm:$0xff]  ;;  %v2835_v7 = vpack.i.bf16 %v935_v4, %v934_v63 }
 0x149   : > { %v2830_v8 = vpack.i.bf16 %v931_v5, %v930_v1  ;;  %v950_v9 = vld [vmem:[#allocation2 + $0x6] sm:$0xff]  ;;  %2841 = vrot.lane.b32.xlu2 %v2840_v6, %s3892_s27 }
 0x14a   : > { %v946_v10 = vld [vmem:[#allocation2 + $0x5] sm:$0xff]  ;;  %2836 = vrot.lane.b32.xlu1 %v2835_v7, %s3931_s0 }
 0x14b   : > { %v942_v11 = vld [vmem:[#allocation2 + $0x4] sm:$0xff]  ;;  %2831 = vrot.lane.b32.xlu0 %v2830_v8, %s3932_s23 }
 0x14c   : > { %1168 = vst [vmem:[#allocation2] sm:$0xff] %v3140_v0  ;;  %v895_v12 = vpop.f32.mrf.mxu0  ;;  %v927_v20 = vld [vmem:[#allocation2 + $0x8] sm:$0xff] }
 0x14d   : > { %v3415_v13 = vadd.f32 %v3035_v55, %v895_v12 }
 0x14e   : > { %v951_v14 = vld [vmem:[#allocation2 + $0xe] sm:$0xff] }
 0x14f   : > { %v947_v15 = vld [vmem:[#allocation2 + $0xd] sm:$0xff]  ;;  %925 = vst.msk [vmem:[#allocation2 + $0x1b] sm:$0xff] %vm817_vm2, %v3415_v13  ;;  %v2855_v17 = vpack.i.bf16 %v951_v14, %v950_v9 }
 0x150   : > { %v943_v16 = vld [vmem:[#allocation2 + $0xc] sm:$0xff]  ;;  %v2850_v18 = vpack.i.bf16 %v947_v15, %v946_v10 }
 0x151   : > { %v2845_v19 = vpack.i.bf16 %v943_v16, %v942_v11  ;;  %1169 = vst [vmem:[#allocation2 + $0x8] sm:$0xff] %v3140_v0  ;;  %2856 = vrot.lane.b32.xlu2 %v2855_v17, %s3900_s28  ;;  %v940_v21 = vld [vmem:[#allocation2 + $0x13] sm:$0xff] }
 0x152   : > { %2851 = vrot.lane.b32.xlu1 %v2850_v18, %s3906_s21  ;;  %v936_v22 = vld [vmem:[#allocation2 + $0x12] sm:$0xff] }
 0x153   : > { %2846 = vrot.lane.b32.xlu0 %v2845_v19, %s3904_s25  ;;  %v932_v23 = vld [vmem:[#allocation2 + $0x11] sm:$0xff] }
 0x154   : > { %v3423_v30 = vld [vmem:[#allocation2 + $0x10] sm:$0xff] }
 0x156   : > { %v941_v24 = vld [vmem:[#allocation2 + $0x1b] sm:$0xff] }
 0x157   : > { %v937_v25 = vld [vmem:[#allocation2 + $0x1a] sm:$0xff]  ;;  %v2870_v27 = vpack.i.bf16 %v941_v24, %v940_v21 }
 0x158   : > { %v933_v26 = vld [vmem:[#allocation2 + $0x19] sm:$0xff]  ;;  %v2865_v28 = vpack.i.bf16 %v937_v25, %v936_v22 }
 0x159   : > { %v2860_v29 = vpack.i.bf16 %v933_v26, %v932_v23  ;;  %v953_v31 = vld [vmem:[#allocation2 + $0x1e] sm:$0xff]  ;;  %2871 = vrot.lane.b32.xlu2 %v2870_v27, %s3892_s27  ;;  %v952_v34 = vld [vmem:[#allocation2 + $0x16] sm:$0xff]  ;;  %s3938_s27 = smov 64  }
 0x15a   : > { %v949_v32 = vld [vmem:[#allocation2 + $0x1d] sm:$0xff]  ;;  %2866 = vrot.lane.b32.xlu1 %v2865_v28, %s3931_s0  ;;  %v948_v35 = vld [vmem:[#allocation2 + $0x15] sm:$0xff]  ;;  %v2885_v38 = vpack.i.bf16 %v953_v31, %v952_v34 }
 0x15b   : > { %v945_v33 = vld [vmem:[#allocation2 + $0x1c] sm:$0xff]  ;;  %v944_v36 = vld [vmem:[#allocation2 + $0x14] sm:$0xff]  ;;  %2861 = vrot.lane.b32.xlu0 %v2860_v29, %s3932_s23  ;;  %v2880_v39 = vpack.i.bf16 %v949_v32, %v948_v35 }
 0x15c   : > { %1172 = vst [vmem:[#allocation2 + $0x20] sm:$0xff] %v3140_v0  ;;  %v3429_v37 = vld [vmem:[#allocation2 + $0x18] sm:$0xff]  ;;  %v2875_v40 = vpack.i.bf16 %v945_v33, %v944_v36 }
 0x15d   : > { %1170 = vst [vmem:[#allocation2 + $0x10] sm:$0xff] %v3140_v0 }
 0x15e   : > { %1171 = vst [vmem:[#allocation2 + $0x18] sm:$0xff] %v3140_v0 }
 0x161   : > { %2886 = vrot.lane.b32.xlu2 %v2885_v38, %s3900_s28  ;;  %s3935_s28 = smov 48  }
 0x162   : > { %2881 = vrot.lane.b32.xlu1 %v2880_v39, %s3906_s21  ;;  %s3936_s21 = smov 96  }
 0x163   : > { %2876 = vrot.lane.b32.xlu0 %v2875_v40, %s3904_s25  ;;  %s3937_s25 = smov 80  }
 0x1a3   : > { %v2842_v48 = vpop.permute.xlu2 %2841 }
 0x1a4   : > { %v2844_v60 = vunpack.i.h.bf16 %v2842_v48  ;;  %v2843_v3 = vunpack.i.l.bf16 %v2842_v48 }
 0x1ab   : > { %v2857_v55 = vpop.permute.xlu2 %2856 }
 0x1ac   : > { %v2859_v10 = vunpack.i.h.bf16 %v2857_v55  ;;  %v2858_v11 = vunpack.i.l.bf16 %v2857_v55 }
 0x1b3   : > { %v2872_v19 = vpop.permute.xlu2 %2871 }
 0x1b4   : > { %v2874_v33 = vunpack.i.h.bf16 %v2872_v19  ;;  %v2873_v34 = vunpack.i.l.bf16 %v2872_v19 }
 0x1bb   : > { %v2887_v35 = vpop.permute.xlu2 %2886 }
 0x1bc   : > { %v2837_v49 = vpop.permute.xlu1 %2836  ;;  %v2889_v43 = vunpack.i.h.bf16 %v2887_v35  ;;  %v2888_v44 = vunpack.i.l.bf16 %v2887_v35 }
 0x1bd   : > { %v2832_v50 = vpop.permute.xlu0 %2831  ;;  %v2839_v53 = vunpack.i.h.bf16 %v2837_v49  ;;  %v2838_v54 = vunpack.i.l.bf16 %v2837_v49 }
 0x1be   : > { %v2834_v51 = vunpack.i.h.bf16 %v2832_v50  ;;  %v2833_v52 = vunpack.i.l.bf16 %v2832_v50 }
 0x1c0   : > { %v1050_v56 = vsel %vm817_vm2, %v3407_v2, %v2833_v52  ;;  %v1051_v58 = vsel %vm817_vm2, %v927_v20, %v2834_v51  ;;  %v3036_v51 = vld [vmem:[%s3934_s4] ss:$0 sm:$0xff]  ;;  %s620_s4 = sand.u32 1, %s3130_s22  }
 0x1c1   : > { %v1054_v61 = vsel %vm827_vm4, %v1050_v56, %v2838_v54  ;;  %v1055_v63 = vsel %vm827_vm4, %v1051_v58, %v2839_v53  ;;  %s621_s20 = scalar_lea.vmem [#allocation3], %s620_s4 }
 0x1c2   : > { %v1058_v9 = vsel %vm837_vm6, %v1054_v61, %v2843_v3  ;;  %v1059_v2 = vsel %vm837_vm6, %v1055_v63, %v2844_v60 }
 0x1c4   : > { %v2852_v1 = vpop.permute.xlu1 %2851 }
 0x1c5   : > { %v2854_v4 = vunpack.i.h.bf16 %v2852_v1  ;;  %v2853_v5 = vunpack.i.l.bf16 %v2852_v1  ;;  %v2847_v6 = vpop.permute.xlu0 %2846 }
 0x1c6   : > { %v2849_v7 = vunpack.i.h.bf16 %v2847_v6  ;;  %v2848_v8 = vunpack.i.l.bf16 %v2847_v6 }
 0x1c8   : > { %v1063_v12 = vsel %vm1062_vm8, %v1058_v9, %v2848_v8  ;;  %v1064_v14 = vsel %vm1062_vm8, %v1059_v2, %v2849_v7 }
 0x1c9   : > { %v1068_v15 = vsel %vm1067_vm9, %v1063_v12, %v2853_v5  ;;  %v1069_v16 = vsel %vm1067_vm9, %v1064_v14, %v2854_v4 }
 0x1ca   : > { %v1073_v17 = vsel %vm1072_vm10, %v1068_v15, %v2858_v11  ;;  %v1074_v18 = vsel %vm1072_vm10, %v1069_v16, %v2859_v10 }
 0x1cb   : > { %v1077_v20 = vpack.c.bf16 %v1074_v18, %v1073_v17 }
 0x1cc   : > { %v2867_v21 = vpop.permute.xlu1 %2866 }
 0x1cd   : > { %v2862_v22 = vpop.permute.xlu0 %2861  ;;  %2515 = vmatmul.msk.bf16.vlgmr.msra.gmra.mxu1 %vm1124_vm11, %v1077_v20  ;;  %v2869_v25 = vunpack.i.h.bf16 %v2867_v21  ;;  %v2868_v26 = vunpack.i.l.bf16 %v2867_v21 }
 0x1ce   : > { %v2864_v23 = vunpack.i.h.bf16 %v2862_v22  ;;  %v2863_v24 = vunpack.i.l.bf16 %v2862_v22 }
 0x1d0   : > { %v1053_v27 = vsel %vm817_vm2, %v3429_v37, %v2864_v23  ;;  %v1052_v28 = vsel %vm817_vm2, %v3423_v30, %v2863_v24 }
 0x1d1   : > { %v1057_v29 = vsel %vm827_vm4, %v1053_v27, %v2869_v25  ;;  %v1056_v31 = vsel %vm827_vm4, %v1052_v28, %v2868_v26 }
 0x1d2   : > { %v1060_v42 = vsel %vm837_vm6, %v1056_v31, %v2873_v34  ;;  %v1061_v37 = vsel %vm837_vm6, %v1057_v29, %v2874_v33 }
 0x1d4   : > { %v2882_v32 = vpop.permute.xlu1 %2881 }
 0x1d5   : > { %v2884_v36 = vunpack.i.h.bf16 %v2882_v32  ;;  %v2883_v38 = vunpack.i.l.bf16 %v2882_v32  ;;  %v2877_v39 = vpop.permute.xlu0 %2876 }
 0x1d6   : > { %v2879_v40 = vunpack.i.h.bf16 %v2877_v39  ;;  %v2878_v41 = vunpack.i.l.bf16 %v2877_v39 }
 0x1d8   : > { %v1065_v30 = vsel %vm1062_vm8, %v1060_v42, %v2878_v41  ;;  %v1066_v45 = vsel %vm1062_vm8, %v1061_v37, %v2879_v40  ;;  %v2688_v37 = vld [vmem:[%s3868_s5 + $0x30] sm:$0xff] }
 0x1d9   : > { %v1070_v46 = vsel %vm1067_vm9, %v1065_v30, %v2883_v38  ;;  %v1071_v47 = vsel %vm1067_vm9, %v1066_v45, %v2884_v36  ;;  %1380 = vmatpush.bf16.msra.mxu2 %v2688_v37  ;;  %v2685_v30 = vld [vmem:[%s3868_s5 + $0x18] sm:$0xff]  ;;  %v2684_v45 = vld [vmem:[%s3868_s5 + $0x10] sm:$0xff] }
 0x1da   : > { %v1075_v48 = vsel %vm1072_vm10, %v1070_v46, %v2888_v44  ;;  %v1076_v49 = vsel %vm1072_vm10, %v1071_v47, %v2889_v43  ;;  %v2687_v43 = vld [vmem:[%s3868_s5 + $0x28] sm:$0xff]  ;;  %v2686_v44 = vld [vmem:[%s3868_s5 + $0x20] sm:$0xff] }
 0x1db   : > { %v1078_v50 = vpack.c.bf16 %v1076_v49, %v1075_v48  ;;  %v2683_v46 = vld [vmem:[%s3868_s5 + $0x8] sm:$0xff]  ;;  %v2682_v47 = vld [vmem:[%s3868_s5] sm:$0xff] }
 0x1dd   : > { %2516 = vmatmul.msk.bf16.gmra.mxu1 %vm1124_vm11, %v1078_v50  ;;  %1381 = vmatpush.bf16.msra.mxu2 %v2687_v43 }
 0x1e1   : > { %1382 = vmatpush.bf16.msra.mxu2 %v2686_v44 }
 0x1e5   : > { %1383 = vmatpush.bf16.msra.mxu2 %v2685_v30 }
 0x1e9   : > { %1384 = vmatpush.bf16.msra.mxu2 %v2684_v45 }
 0x1ed   : > { %1385 = vmatpush.bf16.msra.mxu2 %v2683_v46 }
 0x1f1   : > { %1386 = vmatpush.bf16.msra.mxu2 %v2682_v47 }
 0x24a   : > { %v1140_v52 = vpop.f32.mrf.mxu1 }
 0x24b   : > { %v1141_v53 = vadd.f32 %v3036_v51, %v1140_v52 }
 0x24d   : > { %v1150_v54 = vmax.f32 %v1141_v53, 0.0 }
 0x24f   : > { %1177 = vst.msk [vmem:[#allocation2 + $0x3] sm:$0xff] %vm817_vm2, %v1150_v54 }
 0x252   : > { %v1142_v55 = vpop.f32.mrf.mxu1 }
 0x253   : > { %v1143_v56 = vadd.f32 %v3036_v51, %v1142_v55 }
 0x255   : > { %v1151_v58 = vmax.f32 %v1143_v56, 0.0 }
 0x256   : > { %v1193_v1 = vld [vmem:[#allocation2 + $0x3] sm:$0xff] }
 0x257   : > { %1178 = vst.msk [vmem:[#allocation2 + $0xb] sm:$0xff] %vm817_vm2, %v1151_v58  ;;  %v1189_v3 = vld [vmem:[#allocation2 + $0x2] sm:$0xff] }
 0x258   : > { %v1185_v4 = vld [vmem:[#allocation2 + $0x1] sm:$0xff] }
 0x259   : > { %v1181_v55 = vld [vmem:[#allocation2] sm:$0xff] }
 0x25a   : > { %v1145_v60 = vpop.f32.mrf.mxu1 }
 0x25b   : > { %v1146_v61 = vadd.f32 %v3036_v51, %v1145_v60 }
 0x25d   : > { %v1152_v63 = vmax.f32 %v1146_v61, 0.0 }
 0x25e   : > { %v1194_v5 = vld [vmem:[#allocation2 + $0xb] sm:$0xff] }
 0x25f   : > { %v1190_v6 = vld [vmem:[#allocation2 + $0xa] sm:$0xff]  ;;  %1179 = vst.msk [vmem:[#allocation2 + $0x13] sm:$0xff] %vm817_vm2, %v1152_v63  ;;  %v2900_v8 = vpack.i.bf16 %v1194_v5, %v1193_v1 }
 0x260   : > { %v1186_v7 = vld [vmem:[#allocation2 + $0x9] sm:$0xff]  ;;  %v2895_v9 = vpack.i.bf16 %v1190_v6, %v1189_v3 }
 0x261   : > { %v2890_v2 = vpack.i.bf16 %v1186_v7, %v1185_v4  ;;  %2901 = vrot.lane.b32.xlu2 %v2900_v8, %s3935_s28  ;;  %v1205_v14 = vld [vmem:[#allocation2 + $0x6] sm:$0xff] }
 0x262   : > { %2896 = vrot.lane.b32.xlu1 %v2895_v9, %s3931_s0  ;;  %v1147_v10 = vpop.f32.mrf.mxu1  ;;  %v1201_v15 = vld [vmem:[#allocation2 + $0x5] sm:$0xff] }
 0x263   : > { %2891 = vrot.lane.b32.xlu0 %v2890_v2, %s3932_s23  ;;  %v1148_v11 = vadd.f32 %v3036_v51, %v1147_v10  ;;  %v1197_v16 = vld [vmem:[#allocation2 + $0x4] sm:$0xff] }
 0x264   : > { %v1182_v56 = vld [vmem:[#allocation2 + $0x8] sm:$0xff] }
 0x265   : > { %v1153_v12 = vmax.f32 %v1148_v11, 0.0 }
 0x266   : > { %v1206_v17 = vld [vmem:[#allocation2 + $0xe] sm:$0xff] }
 0x267   : > { %v1202_v18 = vld [vmem:[#allocation2 + $0xd] sm:$0xff]  ;;  %1180 = vst.msk [vmem:[#allocation2 + $0x1b] sm:$0xff] %vm817_vm2, %v1153_v12  ;;  %v2915_v20 = vpack.i.bf16 %v1206_v17, %v1205_v14 }
 0x268   : > { %v1198_v19 = vld [vmem:[#allocation2 + $0xc] sm:$0xff]  ;;  %v2910_v21 = vpack.i.bf16 %v1202_v18, %v1201_v15 }
 0x269   : > { %v2905_v22 = vpack.i.bf16 %v1198_v19, %v1197_v16  ;;  %2916 = vrot.lane.b32.xlu2 %v2915_v20, %s3936_s21  ;;  %v1195_v23 = vld [vmem:[#allocation2 + $0x13] sm:$0xff] }
 0x26a   : > { %2911 = vrot.lane.b32.xlu1 %v2910_v21, %s3937_s25  ;;  %v1191_v24 = vld [vmem:[#allocation2 + $0x12] sm:$0xff] }
 0x26b   : > { %2906 = vrot.lane.b32.xlu0 %v2905_v22, %s3938_s27  ;;  %v1187_v25 = vld [vmem:[#allocation2 + $0x11] sm:$0xff] }
 0x26e   : > { %v1196_v26 = vld [vmem:[#allocation2 + $0x1b] sm:$0xff] }
 0x26f   : > { %v1192_v27 = vld [vmem:[#allocation2 + $0x1a] sm:$0xff]  ;;  %v2930_v29 = vpack.i.bf16 %v1196_v26, %v1195_v23 }
 0x270   : > { %v1188_v28 = vld [vmem:[#allocation2 + $0x19] sm:$0xff]  ;;  %v2925_v31 = vpack.i.bf16 %v1192_v27, %v1191_v24 }
 0x271   : > { %v2920_v32 = vpack.i.bf16 %v1188_v28, %v1187_v25  ;;  %v1208_v33 = vld [vmem:[#allocation2 + $0x1e] sm:$0xff]  ;;  %2931 = vrot.lane.b32.xlu2 %v2930_v29, %s3935_s28  ;;  %v1207_v36 = vld [vmem:[#allocation2 + $0x16] sm:$0xff] }
 0x272   : > { %v1204_v34 = vld [vmem:[#allocation2 + $0x1d] sm:$0xff]  ;;  %2926 = vrot.lane.b32.xlu1 %v2925_v31, %s3931_s0  ;;  %v1203_v38 = vld [vmem:[#allocation2 + $0x15] sm:$0xff]  ;;  %v2945_v40 = vpack.i.bf16 %v1208_v33, %v1207_v36 }
 0x273   : > { %v1200_v35 = vld [vmem:[#allocation2 + $0x1c] sm:$0xff]  ;;  %2921 = vrot.lane.b32.xlu0 %v2920_v32, %s3932_s23  ;;  %v1199_v39 = vld [vmem:[#allocation2 + $0x14] sm:$0xff]  ;;  %v2940_v41 = vpack.i.bf16 %v1204_v34, %v1203_v38 }
 0x274   : > { %1473 = vst [vmem:[#allocation2 + $0x20] sm:$0xff] %v3140_v0  ;;  %v2935_v42 = vpack.i.bf16 %v1200_v35, %v1199_v39  ;;  %v1183_v29 = vld [vmem:[#allocation2 + $0x10] sm:$0xff]  ;;  %v1184_v31 = vld [vmem:[#allocation2 + $0x18] sm:$0xff] }
 0x279   : > { %2946 = vrot.lane.b32.xlu2 %v2945_v40, %s3936_s21 }
 0x27a   : > { %2941 = vrot.lane.b32.xlu1 %v2940_v41, %s3937_s25 }
 0x27b   : > { %2936 = vrot.lane.b32.xlu0 %v2935_v42, %s3938_s27 }
 0x2bb   : > { %v2902_v48 = vpop.permute.xlu2 %2901 }
 0x2bc   : > { %v2904_v4 = vunpack.i.h.bf16 %v2902_v48  ;;  %v2903_v5 = vunpack.i.l.bf16 %v2902_v48 }
 0x2c3   : > { %v2917_v58 = vpop.permute.xlu2 %2916 }
 0x2c4   : > { %v2919_v12 = vunpack.i.h.bf16 %v2917_v58  ;;  %v2918_v14 = vunpack.i.l.bf16 %v2917_v58 }
 0x2cb   : > { %v2932_v21 = vpop.permute.xlu2 %2931 }
 0x2cc   : > { %v2934_v38 = vunpack.i.h.bf16 %v2932_v21  ;;  %v2933_v39 = vunpack.i.l.bf16 %v2932_v21 }
 0x2d3   : > { %v2947_v40 = vpop.permute.xlu2 %2946 }
 0x2d4   : > { %v2897_v49 = vpop.permute.xlu1 %2896  ;;  %v2949_v46 = vunpack.i.h.bf16 %v2947_v40  ;;  %v2948_v47 = vunpack.i.l.bf16 %v2947_v40 }
 0x2d5   : > { %v2892_v50 = vpop.permute.xlu0 %2891  ;;  %v2899_v53 = vunpack.i.h.bf16 %v2897_v49  ;;  %v2898_v54 = vunpack.i.l.bf16 %v2897_v49 }
 0x2d6   : > { %v2894_v51 = vunpack.i.h.bf16 %v2892_v50  ;;  %v2893_v52 = vunpack.i.l.bf16 %v2892_v50 }
 0x2d8   : > { %v1305_v60 = vsel %vm817_vm2, %v1181_v55, %v2893_v52  ;;  %v1306_v61 = vsel %vm817_vm2, %v1182_v56, %v2894_v51  ;;  %v2689_v55 = vld [vmem:[%s3876_s13] sm:$0xff] }
 0x2d9   : > { %v1309_v63 = vsel %vm827_vm4, %v1305_v60, %v2898_v54  ;;  %v1310_v1 = vsel %vm827_vm4, %v1306_v61, %v2899_v53  ;;  %1447 = vmatpush.bf16.msra.mxu3 %v2689_v55  ;;  %v3037_v60 = vld [vmem:[%s3869_s6] ss:$0 sm:$0xff] }
 0x2da   : > { %v1313_v10 = vsel %vm837_vm6, %v1309_v63, %v2903_v5  ;;  %v1314_v11 = vsel %vm837_vm6, %v1310_v1, %v2904_v4 }
 0x2dc   : > { %v2912_v3 = vpop.permute.xlu1 %2911 }
 0x2dd   : > { %v2914_v6 = vunpack.i.h.bf16 %v2912_v3  ;;  %v2913_v7 = vunpack.i.l.bf16 %v2912_v3  ;;  %v2907_v8 = vpop.permute.xlu0 %2906  ;;  %v3038_v3 = vld [vmem:[%s3870_s7] ss:$0 sm:$0xff] }
 0x2de   : > { %v2909_v9 = vunpack.i.h.bf16 %v2907_v8  ;;  %v2908_v2 = vunpack.i.l.bf16 %v2907_v8 }
 0x2e0   : > { %v1317_v15 = vsel %vm1062_vm8, %v1313_v10, %v2908_v2  ;;  %v1318_v16 = vsel %vm1062_vm8, %v1314_v11, %v2909_v9 }
 0x2e1   : > { %v1321_v17 = vsel %vm1067_vm9, %v1317_v15, %v2913_v7  ;;  %v1322_v18 = vsel %vm1067_vm9, %v1318_v16, %v2914_v6 }
 0x2e2   : > { %v1325_v19 = vsel %vm1072_vm10, %v1321_v17, %v2918_v14  ;;  %v1326_v20 = vsel %vm1072_vm10, %v1322_v18, %v2919_v12 }
 0x2e3   : > { %v1329_v22 = vpack.c.bf16 %v1326_v20, %v1325_v19 }
 0x2e4   : > { %v2927_v23 = vpop.permute.xlu1 %2926 }
 0x2e5   : > { %v2922_v24 = vpop.permute.xlu0 %2921  ;;  %2545 = vmatmul.msk.bf16.vlgmr.msra.gmra.mxu2 %vm1124_vm11, %v1329_v22  ;;  %v2929_v27 = vunpack.i.h.bf16 %v2927_v23  ;;  %v2928_v28 = vunpack.i.l.bf16 %v2927_v23 }
 0x2e6   : > { %v2924_v25 = vunpack.i.h.bf16 %v2922_v24  ;;  %v2923_v26 = vunpack.i.l.bf16 %v2922_v24 }
 0x2e8   : > { %v1308_v32 = vsel %vm817_vm2, %v1184_v31, %v2924_v25  ;;  %v1307_v33 = vsel %vm817_vm2, %v1183_v29, %v2923_v26 }
 0x2e9   : > { %v1312_v34 = vsel %vm827_vm4, %v1308_v32, %v2929_v27  ;;  %v1311_v35 = vsel %vm827_vm4, %v1307_v33, %v2928_v28 }
 0x2ea   : > { %v1315_v30 = vsel %vm837_vm6, %v1311_v35, %v2933_v39  ;;  %v1316_v45 = vsel %vm837_vm6, %v1312_v34, %v2934_v38 }
 0x2ec   : > { %v2942_v36 = vpop.permute.xlu1 %2941 }
 0x2ed   : > { %v2944_v41 = vunpack.i.h.bf16 %v2942_v36  ;;  %v2943_v42 = vunpack.i.l.bf16 %v2942_v36  ;;  %v2937_v37 = vpop.permute.xlu0 %2936 }
 0x2ee   : > { %v2939_v43 = vunpack.i.h.bf16 %v2937_v37  ;;  %v2938_v44 = vunpack.i.l.bf16 %v2937_v37 }
 0x2f0   : > { %v1319_v48 = vsel %vm1062_vm8, %v1315_v30, %v2938_v44  ;;  %v1320_v49 = vsel %vm1062_vm8, %v1316_v45, %v2939_v43 }
 0x2f1   : > { %v1323_v50 = vsel %vm1067_vm9, %v1319_v48, %v2943_v42  ;;  %v1324_v51 = vsel %vm1067_vm9, %v1320_v49, %v2944_v41 }
 0x2f2   : > { %v1327_v52 = vsel %vm1072_vm10, %v1323_v50, %v2948_v47  ;;  %v1328_v53 = vsel %vm1072_vm10, %v1324_v51, %v2949_v46 }
 0x2f3   : > { %v1330_v54 = vpack.c.bf16 %v1328_v53, %v1327_v52 }
 0x2f5   : > { %2546 = vmatmul.msk.bf16.gmra.mxu2 %vm1124_vm11, %v1330_v54 }
 0x368   : > { %v1388_v56 = vpop.f32.mrf.mxu2 }
 0x369   : > { %v1389_v58 = vadd.f32 %v1388_v56, %v3397_v57 }
 0x36b   : > { %1418 = vst.msk [vmem:[#allocation2] sm:$0xff] %vm817_vm2, %v1389_v58  ;;  %v1402_v1 = vmul.f32 %v3037_v60, %v1389_v58 }
 0x36d   : > { %v1410_v4 = vadd.f32 %v3038_v3, %v1402_v1 }
 0x36f   : > { %v1414_v8 = vmax.f32 %v1410_v4, 0.0  ;;  %v2694_v4 = vld [vmem:[%s3871_s8 + $0x20] sm:$0xff] }
 0x370   : > { %v1390_v61 = vpop.f32.mrf.mxu2 }
 0x371   : > { %v1391_v63 = vadd.f32 %v1390_v61, %v3401_v59 }
 0x373   : > { %1419 = vst.msk [vmem:[#allocation2 + $0x8] sm:$0xff] %vm817_vm2, %v1391_v63  ;;  %v1403_v11 = vmul.f32 %v3037_v60, %v1391_v63 }
 0x375   : > { %v1411_v14 = vadd.f32 %v3038_v3, %v1403_v11 }
 0x377   : > { %v1415_v21 = vmax.f32 %v1411_v14, 0.0 }
 0x378   : > { %v1393_v5 = vpop.f32.mrf.mxu2 }
 0x379   : > { %v1394_v57 = vadd.f32 %v1393_v5, %v3405_v62  ;;  %v2693_v5 = vld [vmem:[%s3871_s8 + $0x18] sm:$0xff] }
 0x37a   : > { %v1422_v6 = vld [vmem:[#allocation2] ss:$2 sm:$0xff]  ;;  %v1424_v7 = vld [vmem:[#allocation2 + $0x1] ss:$2 sm:$0xff] }
 0x37b   : > { %1420 = vst.msk [vmem:[#allocation2 + $0x10] sm:$0xff] %vm817_vm2, %v1394_v57  ;;  %v1404_v2 = vmul.f32 %v3037_v60, %v1394_v57  ;;  %v1426_v18 = vmax.f32 %v1422_v6, %v1424_v7  ;;  %v2692_v57 = vld [vmem:[%s3871_s8 + $0x10] sm:$0xff]  ;;  %v2691_v6 = vld [vmem:[%s3871_s8 + $0x8] sm:$0xff]  ;;  %v2690_v7 = vld [vmem:[%s3871_s8] sm:$0xff] }
 0x37c   : > { %1469 = vst [vmem:[#allocation2] sm:$0xff] %v3140_v0 }
 0x37d   : > { %1470 = vst [vmem:[#allocation2 + $0x8] sm:$0xff] %v3140_v0  ;;  %v1412_v62 = vadd.f32 %v3038_v3, %v1404_v2 }
 0x37e   : > { %1478 = vst.msk [vmem:[#allocation2 + $0x3] sm:$0xff] %vm817_vm2, %v1414_v8 }
 0x37f   : > { %v1416_v17 = vmax.f32 %v1412_v62, 0.0 }
 0x380   : > { %v1395_v59 = vpop.f32.mrf.mxu2 }
 0x381   : > { %v1396_v9 = vadd.f32 %v1395_v59, %v3415_v13 }
 0x383   : > { %1421 = vst.msk [vmem:[#allocation2 + $0x18] sm:$0xff] %vm817_vm2, %v1396_v9  ;;  %v1405_v10 = vmul.f32 %v3037_v60, %v1396_v9 }
 0x385   : > { %v1413_v12 = vadd.f32 %v3038_v3, %v1405_v10  ;;  %v1494_v22 = vld [vmem:[#allocation2 + $0x3] sm:$0xff] }
 0x386   : > { %v1490_v23 = vld [vmem:[#allocation2 + $0x2] sm:$0xff] }
 0x387   : > { %v1417_v20 = vmax.f32 %v1413_v12, 0.0  ;;  %v1486_v24 = vld [vmem:[#allocation2 + $0x1] sm:$0xff] }
 0x388   : > { %v3579_v32 = vld [vmem:[#allocation2] sm:$0xff]  ;;  %v2695_v3 = vld [vmem:[%s3871_s8 + $0x28] sm:$0xff] }
 0x38a   : > { %v1423_v15 = vld [vmem:[#allocation2 + $0x10] ss:$2 sm:$0xff]  ;;  %v1425_v16 = vld [vmem:[#allocation2 + $0x11] ss:$2 sm:$0xff] }
 0x38b   : > { %v1427_v19 = vmax.f32 %v1423_v15, %v1425_v16  ;;  %1471 = vst [vmem:[#allocation2 + $0x10] sm:$0xff] %v3140_v0 }
 0x38c   : > { %1472 = vst [vmem:[#allocation2 + $0x18] sm:$0xff] %v3140_v0 }
 0x38d   : > { %v1430_v13 = vpack.c.bf16 %v1427_v19, %v1426_v18  ;;  %1480 = vst.msk [vmem:[#allocation2 + $0x13] sm:$0xff] %vm817_vm2, %v1416_v17 }
 0x38e   : > { %1481 = vst.msk [vmem:[#allocation2 + $0x1b] sm:$0xff] %vm817_vm2, %v1417_v20 }
 0x38f   : > { %2551 = vmatmul.msk.bf16.vlgmr.msra.gmra.mxu3 %vm817_vm2, %v1430_v13  ;;  %1479 = vst.msk [vmem:[#allocation2 + $0xb] sm:$0xff] %vm817_vm2, %v1415_v21 }
 0x394   : > { %v1496_v37 = vld [vmem:[#allocation2 + $0x13] sm:$0xff] }
 0x395   : > { %v1497_v36 = vld [vmem:[#allocation2 + $0x1b] sm:$0xff] }
 0x396   : > { %v1495_v25 = vld [vmem:[#allocation2 + $0xb] sm:$0xff]  ;;  %v1493_v38 = vld [vmem:[#allocation2 + $0x1a] sm:$0xff]  ;;  %v2990_v56 = vpack.i.bf16 %v1497_v36, %v1496_v37 }
 0x397   : > { %v1491_v26 = vld [vmem:[#allocation2 + $0xa] sm:$0xff]  ;;  %v2960_v28 = vpack.i.bf16 %v1495_v25, %v1494_v22  ;;  %v1489_v39 = vld [vmem:[#allocation2 + $0x19] sm:$0xff] }
 0x398   : > { %v1487_v27 = vld [vmem:[#allocation2 + $0x9] sm:$0xff]  ;;  %v2955_v29 = vpack.i.bf16 %v1491_v26, %v1490_v23  ;;  %v1492_v43 = vld [vmem:[#allocation2 + $0x12] sm:$0xff]  ;;  %v1509_v44 = vld [vmem:[#allocation2 + $0x1e] sm:$0xff] }
 0x399   : > { %v2950_v31 = vpack.i.bf16 %v1487_v27, %v1486_v24  ;;  %v1506_v33 = vld [vmem:[#allocation2 + $0x6] sm:$0xff]  ;;  %2961 = vrot.lane.b32.xlu2 %v2960_v28, %s3935_s28  ;;  %v1507_v40 = vld [vmem:[#allocation2 + $0xe] sm:$0xff]  ;;  %v1505_v30 = vld [vmem:[#allocation2 + $0x1d] sm:$0xff]  ;;  %v2985_v58 = vpack.i.bf16 %v1493_v38, %v1492_v43 }
 0x39a   : > { %v1502_v34 = vld [vmem:[#allocation2 + $0x5] sm:$0xff]  ;;  %2956 = vrot.lane.b32.xlu1 %v2955_v29, %s3931_s0  ;;  %v1503_v41 = vld [vmem:[#allocation2 + $0xd] sm:$0xff]  ;;  %v1501_v45 = vld [vmem:[#allocation2 + $0x1c] sm:$0xff]  ;;  %v2975_v53 = vpack.i.bf16 %v1507_v40, %v1506_v33 }
 0x39b   : > { %v1498_v35 = vld [vmem:[#allocation2 + $0x4] sm:$0xff]  ;;  %2951 = vrot.lane.b32.xlu0 %v2950_v31, %s3932_s23  ;;  %v1499_v42 = vld [vmem:[#allocation2 + $0xc] sm:$0xff]  ;;  %v1508_v47 = vld [vmem:[#allocation2 + $0x16] sm:$0xff]  ;;  %1738 = vst [vmem:[#allocation2 + $0x20] sm:$0xff] %v3140_v0  ;;  %v2970_v54 = vpack.i.bf16 %v1503_v41, %v1502_v34 }
 0x39c   : > { %1734 = vst [vmem:[#allocation2] sm:$0xff] %v3140_v0  ;;  %v1488_v46 = vld [vmem:[#allocation2 + $0x11] sm:$0xff]  ;;  %v1483_v48 = vld [vmem:[#allocation2 + $0x8] sm:$0xff]  ;;  %v2965_v55 = vpack.i.bf16 %v1499_v42, %v1498_v35  ;;  %v3005_v61 = vpack.i.bf16 %v1509_v44, %v1508_v47 }
 0x39d   : > { %v1504_v49 = vld [vmem:[#allocation2 + $0x15] sm:$0xff]  ;;  %1735 = vst [vmem:[#allocation2 + $0x8] sm:$0xff] %v3140_v0  ;;  %v2980_v60 = vpack.i.bf16 %v1489_v39, %v1488_v46 }
 0x39e   : > { %v1500_v50 = vld [vmem:[#allocation2 + $0x14] sm:$0xff]  ;;  %v3000_v63 = vpack.i.bf16 %v1505_v30, %v1504_v49 }
 0x39f   : > { %v3587_v51 = vld [vmem:[#allocation2 + $0x10] sm:$0xff]  ;;  %v3589_v52 = vld [vmem:[#allocation2 + $0x18] sm:$0xff]  ;;  %v2995_v1 = vpack.i.bf16 %v1501_v45, %v1500_v50 }
 0x3a0   : > { %1736 = vst [vmem:[#allocation2 + $0x10] sm:$0xff] %v3140_v0 }
 0x3a1   : > { %1737 = vst [vmem:[#allocation2 + $0x18] sm:$0xff] %v3140_v0  ;;  %2976 = vrot.lane.b32.xlu2 %v2975_v53, %s3936_s21  ;;  %v2696_v0 = vld [vmem:[%s3871_s8 + $0x30] sm:$0xff] }
 0x3a2   : > { %2971 = vrot.lane.b32.xlu1 %v2970_v54, %s3937_s25  ;;  %1684 = vmatpush.bf16.msrb.mxu3 %v2696_v0 }
 0x3a3   : > { %2966 = vrot.lane.b32.xlu0 %v2965_v55, %s3938_s27 }
 0x3a6   : > { %1685 = vmatpush.bf16.msrb.mxu3 %v2695_v3 }
 0x3a9   : > { %2991 = vrot.lane.b32.xlu2 %v2990_v56, %s3935_s28 }
 0x3aa   : > { %2986 = vrot.lane.b32.xlu1 %v2985_v58, %s3931_s0  ;;  %1686 = vmatpush.bf16.msrb.mxu3 %v2694_v4 }
 0x3ab   : > { %2981 = vrot.lane.b32.xlu0 %v2980_v60, %s3932_s23  ;;  %s3942_s23 = sld [smem:[#allocation19_spill]] }
 0x3ae   : > { %1687 = vmatpush.bf16.msrb.mxu3 %v2693_v5 }
 0x3b1   : > { %3006 = vrot.lane.b32.xlu2 %v3005_v61, %s3936_s21 }
 0x3b2   : > { %3001 = vrot.lane.b32.xlu1 %v3000_v63, %s3937_s25  ;;  %1688 = vmatpush.bf16.msrb.mxu3 %v2692_v57 }
 0x3b3   : > { %2996 = vrot.lane.b32.xlu0 %v2995_v1, %s3938_s27 }
 0x3b6   : > { %1689 = vmatpush.bf16.msrb.mxu3 %v2691_v6 }
 0x3ba   : > { %1690 = vmatpush.bf16.msrb.mxu3 %v2690_v7 }
 0x3f3   : > { %v2962_v8 = vpop.permute.xlu2 %2961 }
 0x3f4   : > { %v2964_v19 = vunpack.i.h.bf16 %v2962_v8  ;;  %v2963_v20 = vunpack.i.l.bf16 %v2962_v8  ;;  %v3039_v8 = vld [vmem:[%s3872_s9] ss:$0 sm:$0xff] }
 0x3fb   : > { %v2977_v12 = vpop.permute.xlu2 %2976 }
 0x3fc   : > { %v2979_v27 = vunpack.i.h.bf16 %v2977_v12  ;;  %v2978_v28 = vunpack.i.l.bf16 %v2977_v12 }
 0x403   : > { %v2992_v36 = vpop.permute.xlu2 %2991 }
 0x404   : > { %v2993_v49 = vunpack.i.l.bf16 %v2992_v36 }
 0x40b   : > { %v3007_v50 = vpop.permute.xlu2 %3006 }
 0x40c   : > { %v2957_v59 = vpop.permute.xlu1 %2956  ;;  %v3009_v61 = vunpack.i.h.bf16 %v3007_v50  ;;  %v3008_v63 = vunpack.i.l.bf16 %v3007_v50 }
 0x40d   : > { %v2952_v9 = vpop.permute.xlu0 %2951  ;;  %v2959_v11 = vunpack.i.h.bf16 %v2957_v59  ;;  %v2958_v62 = vunpack.i.l.bf16 %v2957_v59 }
 0x40e   : > { %v2954_v2 = vunpack.i.h.bf16 %v2952_v9  ;;  %v2953_v10 = vunpack.i.l.bf16 %v2952_v9 }
 0x410   : > { %v1606_v14 = vsel %vm817_vm2, %v3579_v32, %v2953_v10  ;;  %v1607_v15 = vsel %vm817_vm2, %v1483_v48, %v2954_v2  ;;  %v2994_v48 = vunpack.i.h.bf16 %v2992_v36  ;;  %v2703_v36 = vld [vmem:[%s3873_s10 + $0x30] sm:$0xff] }
 0x411   : > { %v1610_v16 = vsel %vm827_vm4, %v1606_v14, %v2958_v62  ;;  %v1611_v17 = vsel %vm827_vm4, %v1607_v15, %v2959_v11 }
 0x412   : > { %v1614_v25 = vsel %vm837_vm6, %v1610_v16, %v2963_v20  ;;  %v1615_v26 = vsel %vm837_vm6, %v1611_v17, %v2964_v19  ;;  %v3652_v6 = vpop.f32.mrf.mxu3 }
 0x414   : > { %v2972_v18 = vpop.permute.xlu1 %2971 }
 0x415   : > { %v2974_v21 = vunpack.i.h.bf16 %v2972_v18  ;;  %v2973_v13 = vunpack.i.l.bf16 %v2972_v18  ;;  %v2967_v22 = vpop.permute.xlu0 %2966 }
 0x416   : > { %v2969_v23 = vunpack.i.h.bf16 %v2967_v22  ;;  %v2968_v24 = vunpack.i.l.bf16 %v2967_v22 }
 0x418   : > { %v1618_v29 = vsel %vm1062_vm8, %v1614_v25, %v2968_v24  ;;  %v1619_v31 = vsel %vm1062_vm8, %v1615_v26, %v2969_v23 }
 0x419   : > { %v1622_v32 = vsel %vm1067_vm9, %v1618_v29, %v2973_v13  ;;  %v1623_v33 = vsel %vm1067_vm9, %v1619_v31, %v2974_v21 }
 0x41a   : > { %v1626_v34 = vsel %vm1072_vm10, %v1622_v32, %v2978_v28  ;;  %v1627_v35 = vsel %vm1072_vm10, %v1623_v33, %v2979_v27  ;;  %v3654_v7 = vpop.f32.mrf.mxu3 }
 0x41b   : > { %v1630_v38 = vpack.c.bf16 %v1627_v35, %v1626_v34  ;;  %v2704_v34 = vld [vmem:[%s3873_s10 + $0x38] sm:$0xff]  ;;  %v2710_v35 = vld [vmem:[%s3873_s10 + $0x68] sm:$0xff] }
 0x41c   : > { %v2987_v39 = vpop.permute.xlu1 %2986  ;;  %1900 = vmatpush.bf16.msrb.mxu0 %v2704_v34  ;;  %1916 = vmatpush.bf16.msrb.mxu1 %v2710_v35 }
 0x41d   : > { %v2982_v40 = vpop.permute.xlu0 %2981  ;;  %2580 = vmatmul.msk.bf16.vlgmr.msrb.gmra.mxu3 %vm1124_vm11, %v1630_v38  ;;  %v2989_v37 = vunpack.i.h.bf16 %v2987_v39  ;;  %v2988_v43 = vunpack.i.l.bf16 %v2987_v39  ;;  %v2709_v38 = vld [vmem:[%s3873_s10 + $0x60] sm:$0xff]  ;;  %v2702_v39 = vld [vmem:[%s3873_s10 + $0x28] sm:$0xff] }
 0x41e   : > { %v2984_v41 = vunpack.i.h.bf16 %v2982_v40  ;;  %v2983_v42 = vunpack.i.l.bf16 %v2982_v40  ;;  %v2708_v40 = vld [vmem:[%s3873_s10 + $0x58] sm:$0xff] }
 0x420   : > { %v1609_v44 = vsel %vm817_vm2, %v3589_v52, %v2984_v41  ;;  %v1608_v30 = vsel %vm817_vm2, %v3587_v51, %v2983_v42  ;;  %1901 = vmatpush.bf16.msrb.mxu0 %v2703_v36  ;;  %1917 = vmatpush.bf16.msrb.mxu1 %v2709_v38  ;;  %v2701_v41 = vld [vmem:[%s3873_s10 + $0x20] sm:$0xff]  ;;  %v2700_v42 = vld [vmem:[%s3873_s10 + $0x18] sm:$0xff] }
 0x421   : > { %v1613_v45 = vsel %vm827_vm4, %v1609_v44, %v2989_v37  ;;  %v1612_v46 = vsel %vm827_vm4, %v1608_v30, %v2988_v43  ;;  %v2699_v37 = vld [vmem:[%s3873_s10 + $0x10] sm:$0xff]  ;;  %v2698_v43 = vld [vmem:[%s3873_s10 + $0x8] sm:$0xff]  ;;  %v2697_v30 = vld [vmem:[%s3873_s10] sm:$0xff] }
 0x422   : > { %v1616_v60 = vsel %vm837_vm6, %v1612_v46, %v2993_v49  ;;  %v1617_v52 = vsel %vm837_vm6, %v1613_v45, %v2994_v48  ;;  %v2707_v44 = vld [vmem:[%s3873_s10 + $0x50] sm:$0xff]  ;;  %v2706_v45 = vld [vmem:[%s3873_s10 + $0x48] sm:$0xff]  ;;  %v2705_v46 = vld [vmem:[%s3873_s10 + $0x40] sm:$0xff] }
 0x423   : > { %v3042_v36 = vld [vmem:[%s3878_s15] ss:$0 sm:$0xff] }
 0x424   : > { %v3002_v47 = vpop.permute.xlu1 %3001  ;;  %1902 = vmatpush.bf16.msrb.mxu0 %v2702_v39  ;;  %1918 = vmatpush.bf16.msrb.mxu1 %v2708_v40 }
 0x425   : > { %v3004_v53 = vunpack.i.h.bf16 %v3002_v47  ;;  %v3003_v54 = vunpack.i.l.bf16 %v3002_v47  ;;  %v2997_v55 = vpop.permute.xlu0 %2996 }
 0x426   : > { %v2999_v56 = vunpack.i.h.bf16 %v2997_v55  ;;  %v2998_v58 = vunpack.i.l.bf16 %v2997_v55 }
 0x428   : > { %v1620_v51 = vsel %vm1062_vm8, %v1616_v60, %v2998_v58  ;;  %v1621_v1 = vsel %vm1062_vm8, %v1617_v52, %v2999_v56  ;;  %1903 = vmatpush.bf16.msrb.mxu0 %v2701_v41  ;;  %1919 = vmatpush.bf16.msrb.mxu1 %v2707_v44 }
 0x429   : > { %v1624_v0 = vsel %vm1067_vm9, %v1620_v51, %v3003_v54  ;;  %v1625_v3 = vsel %vm1067_vm9, %v1621_v1, %v3004_v53 }
 0x42a   : > { %v1628_v4 = vsel %vm1072_vm10, %v1624_v0, %v3008_v63  ;;  %v1629_v5 = vsel %vm1072_vm10, %v1625_v3, %v3009_v61 }
 0x42b   : > { %v1631_v57 = vpack.c.bf16 %v1629_v5, %v1628_v4 }
 0x42c   : > { %1904 = vmatpush.bf16.msrb.mxu0 %v2700_v42  ;;  %1920 = vmatpush.bf16.msrb.mxu1 %v2706_v45 }
 0x42d   : > { %2581 = vmatmul.msk.bf16.gmra.mxu3 %vm1124_vm11, %v1631_v57 }
 0x430   : > { %1905 = vmatpush.bf16.msrb.mxu0 %v2699_v37  ;;  %1921 = vmatpush.bf16.msrb.mxu1 %v2705_v46 }
 0x434   : > { %1906 = vmatpush.bf16.msrb.mxu0 %v2698_v43 }
 0x438   : > { %1907 = vmatpush.bf16.msrb.mxu0 %v2697_v30 }
 0x4a0   : > { %v1692_v59 = vpop.f32.mrf.mxu3 }
 0x4a1   : > { %v1693_v9 = vadd.f32 %v3039_v8, %v1692_v59 }
 0x4a3   : > { %v1702_v2 = vmax.f32 %v1693_v9, 0.0 }
 0x4a5   : > { %1743 = vst.msk [vmem:[#allocation2 + $0x3] sm:$0xff] %vm827_vm4, %v1702_v2 }
 0x4a8   : > { %v1694_v10 = vpop.f32.mrf.mxu3 }
 0x4a9   : > { %v1695_v11 = vadd.f32 %v3039_v8, %v1694_v10 }
 0x4ab   : > { %v1703_v62 = vmax.f32 %v1695_v11, 0.0 }
 0x4ad   : > { %1744 = vst.msk [vmem:[#allocation2 + $0xb] sm:$0xff] %vm827_vm4, %v1703_v62 }
 0x4b0   : > { %v1697_v12 = vpop.f32.mrf.mxu3 }
 0x4b1   : > { %v1698_v14 = vadd.f32 %v3039_v8, %v1697_v12 }
 0x4b3   : > { %v1704_v15 = vmax.f32 %v1698_v14, 0.0 }
 0x4b4   : > { %v1753_v19 = vld [vmem:[#allocation2 + $0x3] ss:$2 sm:$0xff]  ;;  %v1751_v20 = vld [vmem:[#allocation2 + $0x2] ss:$2 sm:$0xff] }
 0x4b5   : > { %1745 = vst.msk [vmem:[#allocation2 + $0x13] sm:$0xff] %vm827_vm4, %v1704_v15  ;;  %v1749_v21 = vld [vmem:[#allocation2 + $0x1] ss:$2 sm:$0xff]  ;;  %v1747_v58 = vld [vmem:[#allocation2] ss:$2 sm:$0xff] }
 0x4b6   : > { %v1755_v10 = vld [vmem:[#allocation2 + $0x4] ss:$2 sm:$0xff] }
 0x4b8   : > { %v1699_v16 = vpop.f32.mrf.mxu3 }
 0x4b9   : > { %v1700_v17 = vadd.f32 %v3039_v8, %v1699_v16 }
 0x4bb   : > { %v1705_v18 = vmax.f32 %v1700_v17, 0.0  ;;  %v2712_v17 = vld [vmem:[%s3877_s14 + $0x8] sm:$0xff] }
 0x4bc   : > { %v1759_v29 = vld [vmem:[#allocation2 + $0x6] ss:$2 sm:$0xff]  ;;  %v1757_v32 = vld [vmem:[#allocation2 + $0x5] ss:$2 sm:$0xff]  ;;  %1972 = vmatpush.bf16.msrb.mxu2 %v2712_v17 }
 0x4bd   : > { %1746 = vst.msk [vmem:[#allocation2 + $0x1b] sm:$0xff] %vm827_vm4, %v1705_v18  ;;  %v2711_v18 = vld [vmem:[%s3877_s14] sm:$0xff] }
 0x4c0   : > { %1973 = vmatpush.bf16.msrb.mxu2 %v2711_v18 }
 0x4c4   : > { %v1754_v13 = vld [vmem:[#allocation2 + $0x13] ss:$2 sm:$0xff]  ;;  %v1752_v22 = vld [vmem:[#allocation2 + $0x12] ss:$2 sm:$0xff] }
 0x4c5   : > { %v1750_v23 = vld [vmem:[#allocation2 + $0x11] ss:$2 sm:$0xff]  ;;  %v3020_v24 = vpack.i.bf16 %v1754_v13, %v1753_v19  ;;  %v3015_v25 = vpack.i.bf16 %v1752_v22, %v1751_v20  ;;  %v1760_v27 = vld [vmem:[#allocation2 + $0x16] ss:$2 sm:$0xff] }
 0x4c6   : > { %v3010_v26 = vpack.i.bf16 %v1750_v23, %v1749_v21  ;;  %v1758_v28 = vld [vmem:[#allocation2 + $0x15] ss:$2 sm:$0xff]  ;;  %v3030_v31 = vpack.i.bf16 %v1760_v27, %v1759_v29  ;;  %v1748_v56 = vld [vmem:[#allocation2 + $0x10] ss:$2 sm:$0xff]  ;;  %v3040_v22 = vld [vmem:[%s3874_s11] ss:$0 sm:$0xff] }
 0x4c7   : > { %3021 = vrot.lane.b32.xlu2 %v3020_v24, %s3936_s21  ;;  %3016 = vrot.lane.b32.xlu1 %v3015_v25, %s3938_s27  ;;  %v3025_v33 = vpack.i.bf16 %v1758_v28, %v1757_v32  ;;  %v1756_v11 = vld [vmem:[#allocation2 + $0x14] ss:$2 sm:$0xff] }
 0x4c8   : > { %3011 = vrot.lane.b32.xlu0 %v3010_v26, %s3931_s0  ;;  %v3041_v25 = vld [vmem:[%s3875_s12] ss:$0 sm:$0xff] }
 0x4cf   : > { %3031 = vrot.lane.b32.xlu1 %v3030_v31, %s3938_s27 }
 0x4d0   : > { %3026 = vrot.lane.b32.xlu0 %v3025_v33, %s3931_s0  ;;  %s3941_s0 = sld [smem:[#allocation20_spill]] }
 0x4d6   : > { %s2408_s29 = scalar_lea.hbm %s3941_s0, %s3940_s24 }
 0x521   : > { %v3022_v48 = vpop.permute.xlu2 %3021 }
 0x522   : > { %v3024_v60 = vunpack.i.h.bf16 %v3022_v48  ;;  %v3023_v52 = vunpack.i.l.bf16 %v3022_v48 }
 0x539   : > { %v3017_v47 = vpop.permute.xlu1 %3016 }
 0x53a   : > { %v3019_v49 = vunpack.i.h.bf16 %v3017_v47  ;;  %v3018_v50 = vunpack.i.l.bf16 %v3017_v47  ;;  %v3012_v53 = vpop.permute.xlu0 %3011 }
 0x53b   : > { %v3014_v54 = vunpack.i.h.bf16 %v3012_v53  ;;  %v3013_v55 = vunpack.i.l.bf16 %v3012_v53 }
 0x53d   : > { %v1802_v61 = vsel %vm827_vm4, %v1748_v56, %v3014_v54  ;;  %v1801_v63 = vsel %vm827_vm4, %v1747_v58, %v3013_v55 }
 0x53e   : > { %v1803_v51 = vsel %vm1062_vm8, %v1801_v63, %v3018_v50  ;;  %v1804_v1 = vsel %vm1062_vm8, %v1802_v61, %v3019_v49 }
 0x53f   : > { %v1805_v0 = vsel %vm1072_vm10, %v1803_v51, %v3023_v52  ;;  %v1806_v3 = vsel %vm1072_vm10, %v1804_v1, %v3024_v60 }
 0x540   : > { %v1811_v4 = vpack.c.bf16 %v1806_v3, %v1805_v0  ;;  %v1980_v0 = vld [vmem:[%s3879_s16] sm:$0xf] }
 0x541   : > { %v3032_v5 = vpop.permute.xlu1 %3031  ;;  %v2148_v3 = vsel %vm875_vm1, %v1980_v0, 0 }
 0x542   : > { %v3034_v57 = vunpack.i.h.bf16 %v3032_v5  ;;  %v3033_v8 = vunpack.i.l.bf16 %v3032_v5  ;;  %v3027_v59 = vpop.permute.xlu0 %3026  ;;  %1908 = vmatmul.bf16.vlgmr.msrb.gmra.mxu0 %v1811_v4 }
 0x543   : > { %v3029_v9 = vunpack.i.h.bf16 %v3027_v59  ;;  %v3028_v2 = vunpack.i.l.bf16 %v3027_v59 }
 0x545   : > { %v1808_v62 = vsel %vm827_vm4, %v1756_v11, %v3029_v9  ;;  %v1807_v12 = vsel %vm827_vm4, %v1755_v10, %v3028_v2 }
 0x546   : > { %v1809_v14 = vsel %vm1062_vm8, %v1807_v12, %v3033_v8  ;;  %v1810_v15 = vsel %vm1062_vm8, %v1808_v62, %v3034_v57 }
 0x547   : > { %v1812_v16 = vpack.c.bf16 %v1810_v15, %v1809_v14 }
 0x549   : > { %2638 = vmatmul.msk.bf16.vlgmr.msrb.gmra.mxu1 %vm1072_vm10, %v1812_v16 }
 0x5bf   : > { %v1909_v19 = vpop.f32.mrf.mxu0 }
 0x5c0   : > { %v1910_v21 = vadd.f32 %v1909_v19, %v3652_v6 }
 0x5c6   : > { %v1923_v20 = vpop.f32.mrf.mxu1 }
 0x5c7   : > { %v1924_v13 = vadd.f32 %v1923_v20, %v1910_v21  ;;  %v1911_v23 = vpop.f32.mrf.mxu0 }
 0x5c8   : > { %v1912_v26 = vadd.f32 %v1911_v23, %v3654_v7 }
 0x5c9   : > { %v1932_v24 = vmul.f32 %v3040_v22, %v1924_v13 }
 0x5cb   : > { %v1938_v29 = vadd.f32 %v3041_v25, %v1932_v24 }
 0x5cd   : > { %v1940_v33 = vmax.f32 %v1938_v29, 0.0 }
 0x5ce   : > { %v1925_v27 = vpop.f32.mrf.mxu1 }
 0x5cf   : > { %v1926_v28 = vadd.f32 %v1925_v27, %v1912_v26 }
 0x5d1   : > { %v1933_v31 = vmul.f32 %v3040_v22, %v1926_v28 }
 0x5d3   : > { %v1939_v32 = vadd.f32 %v3041_v25, %v1933_v31 }
 0x5d5   : > { %v1941_v6 = vmax.f32 %v1939_v32, 0.0 }
 0x5d7   : > { %v1946_v34 = vpack.c.bf16 %v1941_v6, %v1940_v33 }
 0x5d9   : > { %2647 = vmatmul.msk.bf16.vlgmr.msrb.gmra.mxu2 %vm827_vm4, %v1946_v34 }
 0x65c   : > { %v1975_v35 = vpop.f32.mrf.mxu2 }
 0x65d   : > { %v1976_v39 = vadd.f32 %v3042_v36, %v1975_v35 }
 0x664   : > { %v1977_v38 = vpop.f32.mrf.mxu2 }
 0x665   : > { %v1978_v40 = vadd.f32 %v3042_v36, %v1977_v38 }
 0x667   : > { %v3739_v41 = vpack.c.bf16 %v1978_v40, %v1976_v39 }
 0x669   : > { %1986 = vrot.lane.b32.xlu2 %v3739_v41, %s3936_s21  ;;  %s3150_s21 = smov 72  }
 0x6c3   : > { %v1987_v7 = vpop.permute.xlu2 %1986 }
 0x6c4   : > { %v1992_v42 = vsel %vm653_vm0, %v1987_v7, 0 }
 0x6c5   : > { %2001 = vmatpush.bf16.xpose.msra.mxu0 %v1992_v42 }
 0x6cc   : > { %2648 = vmatmul.msk.bf16.vlgmr.msra.gmra.mxu0 %vm653_vm0, %v3739_v41 }
 0x749   : > { %v2003_v37 = vpop.f32.mrf.mxu0 }
 0x74a   : > { %v2008_v43 = vmul.f32 0.35355338, %v2003_v37 }
 0x74c   : > { %v2010_v44 = vsel %vm817_vm2, %v2008_v43, -inf }
 0x74d   : > { %2011 = vmax.xlane.f32.xlu0 %v2010_v44 }
 0x751   : > { %v2005_v30 = vpop.f32.mrf.mxu0 }
 0x752   : > { %v2009_v45 = vmul.f32 0.35355338, %v2005_v30 }
 0x754   : > { %v2013_v46 = vsel %vm817_vm2, %v2009_v45, -inf }
 0x755   : > { %2014 = vmax.xlane.f32.xlu1 %v2013_v46 }
 0x761   : > { %2033 = vrot.lane.b32.xlu0 %v3739_v41, %s3938_s27  ;;  %s3154_s27 = smov 112  }
 0x769   : > { %2258 = vrot.lane.b32.xlu0 %v3739_v41, %s3150_s21  ;;  %s2410_s21 = sshll.u32 %s621_s20, 4  ;;  %s2411_s21 = int_to_ptr.vmem [resolvable:$true] %s2410_s21 }
 0x76e   : > { %2056 = vrot.lane.b32.xlu1 %v3739_v41, %s3151_s2  ;;  %s2412_s2 = sshll.u32 %s2408_s29, 4  ;;  %s2413_s2 = int_to_ptr.hbm [resolvable:$true] %s2412_s2 }
 0x771   : > { %2256 = vrot.lane.b32.xlu0 %v3739_v41, %s3152_s30  ;;  %s2400_s30 = scalar_lea.sflag [#allocation4], %s620_s4 }
 0x776   : > { %2166 = vrot.lane.b32.xlu1 %v3739_v41, %s3937_s25  ;;  %s3153_s25 = smov 120  }
 0x7c0   : > { %v2012_v47 = vpop.xlane.xlu0 %2011 }
 0x7c1   : > { %v2016_v48 = vsub.f32 %v2008_v43, %v2012_v47 }
 0x7c3   : > { %v2018_v49 = vmul.f32 1.442695, %v2016_v48 }
 0x7c5   : > { %3044 = vpow2.f32 %v2018_v49 }
 0x7c8   : > { %v2015_v50 = vpop.xlane.xlu1 %2014 }
 0x7c9   : > { %v2017_v53 = vsub.f32 %v2009_v45, %v2015_v50 }
 0x7cb   : > { %v3045_v54 = vpop.eup %3044  ;;  %v2020_v55 = vmul.f32 1.442695, %v2017_v53 }
 0x7cc   : > { %v2022_v56 = vsel %vm817_vm2, %v3045_v54, 0.0 }
 0x7cd   : > { %3046 = vpow2.f32 %v2020_v55  ;;  %2023 = vadd.xlane.f32.xlu2 %v2022_v56 }
 0x7d3   : > { %v3047_v58 = vpop.eup %3046  ;;  %v2034_v60 = vpop.permute.xlu0 %2033 }
 0x7d4   : > { %2046 = vmatpush.bf16.msra.mxu3 %v2034_v60  ;;  %v2025_v52 = vsel %vm817_vm2, %v3047_v58, 0.0 }
 0x7d5   : > { %2026 = vadd.xlane.f32.xlu2 %v2025_v52 }
 0x7d8   : > { %2157 = vmatpush.bf16.msrb.mxu3 %v2148_v3 }
 0x7db   : > { %v2259_v10 = vpop.permute.xlu0 %2258 }
 0x7dc   : > { %v2264_v62 = vsel %vm653_vm0, %v2259_v10, 0 }
 0x7e0   : > { %v2057_v61 = vpop.permute.xlu1 %2056 }
 0x7e1   : > { %v2062_v63 = vsel %vm653_vm0, %v2057_v61, 0 }
 0x7e2   : > { %2071 = vmatpush.bf16.xpose.msra.mxu1 %v2062_v63 }
 0x7e3   : > { %v2257_v28 = vpop.permute.xlu0 %2256 }
 0x7e8   : > { %v2167_v51 = vpop.permute.xlu1 %2166 }
 0x7e9   : > { %v2172_v1 = vsel %vm653_vm0, %v2167_v51, 0 }
 0x7ea   : > { %2181 = vmatpush.bf16.xpose.msrb.mxu1 %v2172_v1 }
 0x7ed   : > { %2054 = vrot.lane.b32.xlu2 %v3739_v41, %s3153_s25  ;;  %s3090_s25 = sshra.s32 %s2413_s2, 4  ;;  %s3091_s25 = int_to_ptr.hbm [resolvable:$true] %s3090_s25 }
 0x7ee   : > { %p3097_p0 = scmp.lt.s32.totalorder %s3091_s25, %s3941_s0 }
 0x7f5   : > { %2164 = vrot.lane.b32.xlu2 %v3739_v41, %s3154_s27  ;;  %s3092_s27 = scalar_lea.hbm %s3091_s25, 1 }
 0x7f6   : > { %p3093_p11 = scmp.ne.s32.totalorder %s3091_s25, %s3092_s27 }
 0x7f8   : > { %p3094_p12 = pnand %p3093_p11, %p3299_p5 }
 0x7fa   : > { %p3095_p13 = pneg %p3094_p12 }
 0x840   : > { %v2024_v4 = vpop.xlane.xlu2 %2023 }
 0x841   : > { %3048 = vrcp.f32 %v2024_v4 }
 0x847   : > { %v3049_v57 = vpop.eup %3048 }
 0x848   : > { %v2027_v5 = vpop.xlane.xlu2 %2026  ;;  %v2030_v59 = vmul.f32 %v3049_v57, %v3045_v54 }
 0x849   : > { %3050 = vrcp.f32 %v2027_v5 }
 0x84f   : > { %v3051_v8 = vpop.eup %3050 }
 0x850   : > { %v2031_v9 = vmul.f32 %v3051_v8, %v3047_v58  ;;  %v2055_v2 = vpop.permute.xlu2 %2054 }
 0x851   : > { %2650 = vmatmul.msk.bf16.vlgmr.msra.gmra.mxu1 %vm653_vm0, %v2055_v2 }
 0x852   : > { %v2032_v11 = vpack.c.bf16 %v2031_v9, %v2030_v59 }
 0x854   : > { %2649 = vmatmul.msk.bf16.vlgmr.msra.gmra.mxu3 %vm817_vm2, %v2032_v11 }
 0x855   : > { %2273 = vmatpush.bf16.xpose.msra.mxu3 %v2264_v62 }
 0x858   : > { %v2165_v12 = vpop.permute.xlu2 %2164 }
 0x861   : > { %2654 = vmatmul.msk.bf16.vlgmr.msrb.gmra.mxu1 %vm653_vm0, %v2165_v12  ;;  %v1981_v12 = vld [vmem:[%s3879_s16 + $0x4] sm:$0xf] }
 0x8ce   : > { %v2073_v14 = vpop.f32.mrf.mxu1 }
 0x8cf   : > { %v2078_v15 = vmul.f32 0.35355338, %v2073_v14  ;;  %v2128_v14 = vsel %vm875_vm1, %v1981_v12, 0 }
 0x8d0   : > { %2137 = vmatpush.bf16.msrb.mxu0 %v2128_v14 }
 0x8d1   : > { %v2080_v16 = vsel %vm817_vm2, %v2078_v15, -inf }
 0x8d2   : > { %2081 = vmax.xlane.f32.xlu1 %v2080_v16 }
 0x8d6   : > { %v2075_v17 = vpop.f32.mrf.mxu1 }
 0x8d7   : > { %v2079_v18 = vmul.f32 0.35355338, %v2075_v17  ;;  %v2048_v19 = vpop.f32.mrf.mxu3 }
 0x8d9   : > { %v2083_v20 = vsel %vm817_vm2, %v2079_v18, -inf }
 0x8da   : > { %2084 = vmax.xlane.f32.xlu0 %v2083_v20 }
 0x8de   : > { %v2183_v21 = vpop.f32.mrf.mxu1 }
 0x8df   : > { %v2188_v13 = vmul.f32 0.35355338, %v2183_v21  ;;  %v2050_v22 = vpop.f32.mrf.mxu3 }
 0x8e0   : > { %v2053_v23 = vpack.c.bf16 %v2050_v22, %v2048_v19 }
 0x8e1   : > { %v2190_v24 = vsel %vm817_vm2, %v2188_v13, -inf }
 0x8e2   : > { %2653 = vmatmul.msk.bf16.vlgmr.msrb.gmra.mxu3 %vm653_vm0, %v2053_v23  ;;  %2191 = vmax.xlane.f32.xlu2 %v2190_v24 }
 0x8e6   : > { %v2185_v25 = vpop.f32.mrf.mxu1 }
 0x8e7   : > { %v2189_v26 = vmul.f32 0.35355338, %v2185_v25 }
 0x8e9   : > { %v2193_v27 = vsel %vm817_vm2, %v2189_v26, -inf }
 0x8ea   : > { %2194 = vmax.xlane.f32.xlu1 %v2193_v27 }
 0x8f2   : > { %2657 = vmatmul.msk.bf16.vlgmr.msra.gmra.mxu3 %vm653_vm0, %v2257_v28 }
 0x945   : > { %v2082_v29 = vpop.xlane.xlu1 %2081 }
 0x946   : > { %v2086_v31 = vsub.f32 %v2078_v15, %v2082_v29 }
 0x948   : > { %v2088_v32 = vmul.f32 1.442695, %v2086_v31 }
 0x94a   : > { %3052 = vpow2.f32 %v2088_v32 }
 0x94d   : > { %v2085_v7 = vpop.xlane.xlu0 %2084 }
 0x94e   : > { %v2087_v37 = vsub.f32 %v2079_v18, %v2085_v7 }
 0x950   : > { %v3053_v33 = vpop.eup %3052  ;;  %v2090_v43 = vmul.f32 1.442695, %v2087_v37 }
 0x951   : > { %v2092_v6 = vsel %vm817_vm2, %v3053_v33, 0.0 }
 0x952   : > { %2093 = vadd.xlane.f32.xlu1 %v2092_v6 }
 0x955   : > { %v2192_v34 = vpop.xlane.xlu2 %2191 }
 0x956   : > { %v2196_v35 = vsub.f32 %v2188_v13, %v2192_v34  ;;  %v1982_v34 = vld [vmem:[%s3879_s16 + $0x8] sm:$0xf] }
 0x958   : > { %v2198_v36 = vmul.f32 1.442695, %v2196_v35  ;;  %v2238_v35 = vsel %vm875_vm1, %v1982_v34, 0 }
 0x959   : > { %2247 = vmatpush.bf16.msra.mxu0 %v2238_v35 }
 0x95a   : > { %3054 = vpow2.f32 %v2198_v36 }
 0x95b   : > { %3056 = vpow2.f32 %v2090_v43 }
 0x95d   : > { %v2195_v44 = vpop.xlane.xlu1 %2194 }
 0x95e   : > { %v2197_v46 = vsub.f32 %v2189_v26, %v2195_v44 }
 0x960   : > { %v3776_v38 = vpop.eup %3054  ;;  %v2200_v48 = vmul.f32 1.442695, %v2197_v46  ;;  %v2713_v46 = vld [vmem:[%s3881_s18] sm:$0xff] }
 0x961   : > { %v2202_v39 = vsel %vm817_vm2, %v3776_v38, 0.0  ;;  %v3057_v49 = vpop.eup %3056 }
 0x962   : > { %2203 = vadd.xlane.f32.xlu1 %v2202_v39  ;;  %3058 = vpow2.f32 %v2200_v48  ;;  %v2095_v54 = vsel %vm817_vm2, %v3057_v49, 0.0 }
 0x965   : > { %v3780_v40 = vpop.f32.mrf.mxu3 }
 0x968   : > { %v3059_v56 = vpop.eup %3058 }
 0x969   : > { %v2205_v58 = vsel %vm817_vm2, %v3059_v56, 0.0 }
 0x96d   : > { %v3782_v42 = vpop.f32.mrf.mxu3 }
 0x975   : > { %v2275_v30 = vpop.f32.mrf.mxu3 }
 0x976   : > { %v2280_v45 = vmul.f32 0.35355338, %v2275_v30 }
 0x978   : > { %v2282_v47 = vsel %vm817_vm2, %v2280_v45, -inf }
 0x979   : > { %2283 = vmax.xlane.f32.xlu0 %v2282_v47 }
 0x97d   : > { %v2277_v50 = vpop.f32.mrf.mxu3 }
 0x97e   : > { %v2281_v53 = vmul.f32 0.35355338, %v2277_v50 }
 0x980   : > { %v2285_v55 = vsel %vm817_vm2, %v2281_v53, -inf }
 0x981   : > { %2096 = vadd.xlane.f32.xlu0 %v2095_v54  ;;  %2286 = vmax.xlane.f32.xlu2 %v2285_v55  ;;  %v3043_v55 = vld [vmem:[%s3880_s17] ss:$0 sm:$0xff] }
 0x989   : > { %2206 = vadd.xlane.f32.xlu0 %v2205_v58 }
 0x999   : > { %2103 = vrot.lane.b32.xlu2 %v3739_v41, %s3155_s26 }
 0x9c5   : > { %v2094_v63 = vpop.xlane.xlu1 %2093 }
 0x9d5   : > { %v2204_v16 = vpop.xlane.xlu1 %2203 }
 0x9ec   : > { %v2284_v60 = vpop.xlane.xlu0 %2283 }
 0x9ed   : > { %v2288_v52 = vsub.f32 %v2280_v45, %v2284_v60  ;;  %v2714_v45 = vld [vmem:[%s3881_s18 + $0x8] sm:$0xff] }
 0x9ef   : > { %v2290_v61 = vmul.f32 1.442695, %v2288_v52 }
 0x9f1   : > { %3060 = vpow2.f32 %v2290_v61 }
 0x9f2   : > { %3062 = vrcp.f32 %v2094_v63 }
 0x9f4   : > { %v2097_v51 = vpop.xlane.xlu0 %2096  ;;  %v2287_v1 = vpop.xlane.xlu2 %2286 }
 0x9f5   : > { %3064 = vrcp.f32 %v2097_v51  ;;  %v2289_v0 = vsub.f32 %v2281_v53, %v2287_v1 }
 0x9f7   : > { %v3061_v3 = vpop.eup %3060  ;;  %v2292_v4 = vmul.f32 1.442695, %v2289_v0 }
 0x9f8   : > { %v2294_v5 = vsel %vm817_vm2, %v3061_v3, 0.0  ;;  %v3063_v57 = vpop.eup %3062 }
 0x9f9   : > { %3066 = vpow2.f32 %v2292_v4  ;;  %2295 = vadd.xlane.f32.xlu1 %v2294_v5  ;;  %v2100_v59 = vmul.f32 %v3063_v57, %v3053_v33  ;;  %v1983_v33 = vld [vmem:[%s3879_s16 + $0xc] sm:$0xf] }
 0x9fa   : > { %v2330_v6 = vsel %vm875_vm1, %v1983_v33, 0 }
 0x9fb   : > { %v3065_v8 = vpop.eup %3064 }
 0x9fc   : > { %v2101_v9 = vmul.f32 %v3065_v8, %v3057_v49  ;;  %v2104_v2 = vpop.permute.xlu2 %2103  ;;  %v2207_v15 = vpop.xlane.xlu0 %2206 }
 0x9fd   : > { %2116 = vmatpush.bf16.msra.mxu2 %v2104_v2  ;;  %3068 = vrcp.f32 %v2207_v15 }
 0x9fe   : > { %v2102_v10 = vpack.c.bf16 %v2101_v9, %v2100_v59  ;;  %3070 = vrcp.f32 %v2204_v16  ;;  %v2368_v59 = vld [vmem:[%s3942_s23] sm:$0x1] }
 0x9ff   : > { %v3067_v11 = vpop.eup %3066 }
 0xa00   : > { %2651 = vmatmul.msk.bf16.vlgmr.msra.gmra.mxu2 %vm817_vm2, %v2102_v10  ;;  %v2297_v62 = vsel %vm817_vm2, %v3067_v11, 0.0 }
 0xa01   : > { %2298 = vadd.xlane.f32.xlu0 %v2297_v62 }
 0xa03   : > { %v3069_v19 = vpop.eup %3068 }
 0xa04   : > { %v3071_v20 = vpop.eup %3070  ;;  %v2211_v13 = vmul.f32 %v3069_v19, %v3059_v56 }
 0xa05   : > { %v2210_v23 = vmul.f32 %v3071_v20, %v3776_v38 }
 0xa07   : > { %v2212_v26 = vpack.c.bf16 %v2211_v13, %v2210_v23 }
 0xa12   : > { %2213 = vrot.lane.b32.xlu1 %v3739_v41, %s3935_s28 }
 0xa15   : > { %2305 = vrot.lane.b32.xlu0 %v3739_v41, %s3939_s3  ;;  %s3096_s3 = scalar_lea.hbm %s3941_s0, 2 }
 0xa16   : > { %p3098_p1 = scmp.lt.s32.totalorder %s3096_s3, %s3092_s27 }
 0xa18   : > { %p3099_p2 = por %p3098_p1, %p3097_p0 }
 0xa1a   : > { %p3100_p3 = pnand %p3099_p2, %p3095_p13 }
 0xa6c   : > { %v2296_v18 = vpop.xlane.xlu1 %2295 }
 0xa74   : > { %v2299_v17 = vpop.xlane.xlu0 %2298 }
 0xa75   : > { %3072 = vrcp.f32 %v2299_v17 }
 0xa76   : > { %3074 = vrcp.f32 %v2296_v18 }
 0xa7b   : > { %v3073_v21 = vpop.eup %3072 }
 0xa7c   : > { %v3075_v22 = vpop.eup %3074  ;;  %v2303_v25 = vmul.f32 %v3073_v21, %v3067_v11 }
 0xa7d   : > { %v2302_v27 = vmul.f32 %v3075_v22, %v3061_v3 }
 0xa7f   : > { %v2304_v29 = vpack.c.bf16 %v2303_v25, %v2302_v27 }
 0xa83   : > { %v2118_v41 = vpop.f32.mrf.mxu2 }
 0xa84   : > { %v2214_v24 = vpop.permute.xlu1 %2213 }
 0xa85   : > { %2226 = vmatpush.bf16.msrb.mxu2 %v2214_v24 }
 0xa87   : > { %v2306_v28 = vpop.permute.xlu0 %2305 }
 0xa88   : > { %2655 = vmatmul.msk.bf16.vlgmr.msrb.gmra.mxu2 %vm817_vm2, %v2212_v26  ;;  %2318 = vmatpush.bf16.msra.mxu1 %v2306_v28 }
 0xa89   : > { %2339 = vmatpush.bf16.msra.mxu2 %v2330_v6 }
 0xa8b   : > { %v2120_v31 = vpop.f32.mrf.mxu2  ;;  %2658 = vmatmul.msk.bf16.vlgmr.msra.gmra.mxu1 %vm817_vm2, %v2304_v29 }
 0xa8c   : > { %v2123_v32 = vpack.c.bf16 %v2120_v31, %v2118_v41 }
 0xa8e   : > { %2652 = vmatmul.msk.bf16.vlgmr.msrb.gmra.mxu0 %vm653_vm0, %v2123_v32 }
 0xa8f   : > { %2390 = vmatpush.bf16.msrb.mxu0 %v2714_v45 }
 0xa93   : > { %2391 = vmatpush.bf16.msrb.mxu0 %v2713_v46 }
 0xb08   : > { %v2320_v36 = vpop.f32.mrf.mxu1 }
 0xb0b   : > { %v2228_v38 = vpop.f32.mrf.mxu2  ;;  %v2139_v44 = vpop.f32.mrf.mxu0 }
 0xb0c   : > { %v2160_v48 = vadd.f32 %v3780_v40, %v2139_v44 }
 0xb10   : > { %v2322_v39 = vpop.f32.mrf.mxu1 }
 0xb11   : > { %v2325_v7 = vpack.c.bf16 %v2322_v39, %v2320_v36 }
 0xb13   : > { %v2230_v37 = vpop.f32.mrf.mxu2  ;;  %2659 = vmatmul.msk.bf16.vlgmr.msra.gmra.mxu2 %vm653_vm0, %v2325_v7  ;;  %v2141_v30 = vpop.f32.mrf.mxu0 }
 0xb14   : > { %v2233_v43 = vpack.c.bf16 %v2230_v37, %v2228_v38  ;;  %v2162_v53 = vadd.f32 %v3782_v42, %v2141_v30 }
 0xb16   : > { %2656 = vmatmul.msk.bf16.vlgmr.msra.gmra.mxu0 %vm653_vm0, %v2233_v43 }
 0xb93   : > { %v2249_v47 = vpop.f32.mrf.mxu0 }
 0xb94   : > { %v2254_v50 = vadd.f32 %v2249_v47, %v2160_v48 }
 0xb96   : > { %v2341_v49 = vpop.f32.mrf.mxu2 }
 0xb97   : > { %v2346_v54 = vadd.f32 %v2341_v49, %v2254_v50 }
 0xb99   : > { %v2352_v52 = vadd.f32 %v3043_v55, %v2346_v54 }
 0xb9b   : > { %v2251_v56 = vpop.f32.mrf.mxu0  ;;  %v2354_v40 = vsel %vm827_vm4, %v2352_v52, -inf }
 0xb9c   : > { %v2255_v58 = vadd.f32 %v2251_v56, %v2162_v53 }
 0xb9e   : > { %v2343_v60 = vpop.f32.mrf.mxu2 }
 0xb9f   : > { %v2347_v61 = vadd.f32 %v2343_v60, %v2255_v58 }
 0xba1   : > { %v2353_v63 = vadd.f32 %v3043_v55, %v2347_v61 }
 0xba3   : > { %v2355_v51 = vsel %vm827_vm4, %v2353_v63, -inf }
 0xba4   : > { %v2356_v1 = vmax.f32 %v2354_v40, %v2355_v51 }
 0xba6   : > { %v2357_v0 = vrot.slane %v2356_v1, 4 }
 0xba8   : > { %v2358_v42 = vmax.f32 %v2356_v1, %v2357_v0 }
 0xbaa   : > { %v2359_v3 = vrot.slane %v2358_v42, 2 }
 0xbac   : > { %v2360_v4 = vmax.f32 %v2358_v42, %v2359_v3 }
 0xbae   : > { %v2361_v5 = vrot.slane %v2360_v4, 1 }
 0xbb0   : > { %v2362_v57 = vmax.f32 %v2360_v4, %v2361_v5 }
 0xbb2   : > { %v2367_v8 = vpack.c.bf16 %v2362_v57, %v2362_v57 }
 0xbb4   : > { %2668 = vmatmul.msk.bf16.vlgmr.msrb.gmra.mxu0 %vm827_vm4, %v2367_v8 }
 0xc31   : > { %v2393_v9 = vpop.f32.mrf.mxu0 }
 0xc32   : > { %v2394_v2 = vadd.f32 %v2393_v9, %v2368_v59 }
 0xc34   : > { %2398 = vst.msk [vmem:[%s621_s20] sm:$0x1] %vm2397_vm12, %v2394_v2 }
 0xc35   : > { %3103 = shalt.err (!%p3100_p3)
}
 0xc36   : > { %2715 = dma.vmem_to_hbm [thread:$0]  (%p3299_p5), %s2411_s21, 16, %s2413_s2, %s2400_s30  }
 0xc39   : > { %v2395_v10 = vpop.f32.mrf.mxu0 }
 0xc3a PF: > { %s3944_s4 = sld [smem:[#allocation8_spill]] }
 0xc3b   : > { %s3945_s1 = sld [smem:[#allocation6_spill]] }
 0xc40   : > { %p2721_p4 = scmp.ge.s32.totalorder %s3944_s4, 2 }
 0xc41   : > { %s2424_s20 = sand.u32 1, %s3945_s1  }
 0xc42   : > { %p2718_p7 = pnand %p2721_p4, %p3303_p6  ;;  %s2425_s24 = scalar_lea.sflag [#allocation4], %s2424_s20 }
 0xc44   : > { %p2719_p8 = pneg %p2718_p7 }
 0xc46   : > { %3121 = dma.done.wait (%p2719_p8), %s2425_s24, 16  }
 0xc47   : > { %3123 = vsyncadd (%p2719_p8), %s2425_s24, 4294967280  ;;  %s3947_s24 = sld [smem:[#allocation10_spill]]  ;;  %s3950_s1 = smov %s3130_s22 }
 0xc48   : > { %s3948_s25 = sld [smem:[#allocation7_spill]] }
 0xc49   : > { %s3949_s23 = sld [smem:[#allocation11_spill]] }
 0xc4d   : > { %p30_p9 = scmp.ge.s32.totalorder %s3947_s24, 4  }
 0xc4e   : > { %s3951_s22 = smov %s3948_s25 }
 0xc4f   :  { %32 = sbr.rel (!%p30_p9) target bundleno = 11 (0xb), region = 162 }
 0xc54   :  { %2430 = vsyncpa [#allocation4], 1 }
 0xc55   :  { %2432 = vsyncpa [#allocation4 + $0x1], 1 }

</bundles_post_ra>
